<compile_context>
chip_gen: v6e
topology: v6e:2x2x1
jax: 0.10.0
libtpu: 0.0.40
codegen_flags: <defaults>
</compile_context>

<pallas_src>
import functools

import jax
import jax.numpy as jnp
from jax import lax
from jax.experimental import pallas as pl
from jax.experimental.pallas import tpu as pltpu


def lstm_logsoftmax_kernel(x_ref, wih_ref, whh_ref, head_w_ref, head_b_ref,
                           out_ref, h_scr, c_scr, hs_scr):
    """LSTM recurrence + deferred Linear/log_softmax head, all in VMEM.

    x_ref:      (T, Bt, 1)  shifted spins, int32 in {0,1}
    wih_ref:    (2, 4H)     rows of (W_ih^T + b_ih + b_hh); row k = gate input
                            contribution for spin value k (gate order i,f,g,o)
    whh_ref:    (H, 4H)     hidden->gates weights (transposed)
    head_w_ref: (1, 1, H)   w_lin[1] - w_lin[0]
    head_b_ref: (1, 1, 1)   b_lin[1] - b_lin[0]
    out_ref:    (T, Bt, 2)  log-probabilities
    h_scr,c_scr:(Bt, H)     recurrent state
    hs_scr:     (T, Bt, H)  all hidden states (head input, written in-loop)
    """
    T, Bt, _ = x_ref.shape
    H, G = whh_ref.shape                      # G == 4H

    # Hoisted loop invariants (broadcasts are NOT CSE'd inside loops).
    wb0 = jnp.broadcast_to(wih_ref[0:1, :], (Bt, G))   # spin==0 gate input (+bias)
    wb1 = jnp.broadcast_to(wih_ref[1:2, :], (Bt, G))   # spin==1 gate input (+bias)
    lane = lax.broadcasted_iota(jnp.int32, (Bt, G), 1)
    is_g_lane = (lane >= 2 * H) & (lane < 3 * H)       # tanh gate lanes

    h_scr[...] = jnp.zeros_like(h_scr)
    c_scr[...] = jnp.zeros_like(c_scr)

    def step(t, carry):
        # Input contribution: pure VPU row-select (one-hot @ W_ih^T + bias).
        mask = jnp.broadcast_to(x_ref[t] > 0, (Bt, G))
        gates = jnp.where(mask, wb1, wb0) + jnp.dot(
            h_scr[...], whh_ref[...], preferred_element_type=jnp.float32)

        # Full-width activations with a lane mask: sigmoid on i/f/o, tanh on g.
        act = jnp.where(is_g_lane, jnp.tanh(gates), jax.nn.sigmoid(gates))
        i_g = act[:, 0 * H:1 * H]
        f_g = act[:, 1 * H:2 * H]
        g_g = act[:, 2 * H:3 * H]
        o_g = act[:, 3 * H:4 * H]

        c_new = f_g * c_scr[...] + i_g * g_g
        h_new = o_g * jnp.tanh(c_new)
        c_scr[...] = c_new
        h_scr[...] = h_new
        hs_scr[t] = h_new                      # head consumes this after the loop
        return carry

    lax.fori_loop(0, T, step, 0, unroll=True if T <= 16 else 8)

    # Deferred head: Linear(H,2) + log_softmax, vectorized over all (T,Bt).
    # For 2 classes: d = l1 - l0;  logp1 = -softplus(-d), logp0 = -softplus(d).
    hs = hs_scr[...]                                               # (T, Bt, H)
    d = jnp.sum(hs * head_w_ref[...], axis=-1, keepdims=True) + head_b_ref[...]
    shared = jnp.log(1.0 + jnp.exp(-jnp.abs(d)))                   # stable softplus tail
    lp1 = -(jnp.maximum(-d, 0.0) + shared)
    lp0 = -(jnp.maximum(d, 0.0) + shared)
    cls = lax.broadcasted_iota(jnp.int32, out_ref.shape, 2)        # (T, Bt, 2)
    out_ref[...] = jnp.where(cls == 0, lp0, lp1)                   # one bulk store


@functools.partial(jax.jit, static_argnames=("hidden_size", "b_tile"))
def rnn1d_forward(x, params, *, hidden_size, b_tile=None):
    """x: (B, N) int spins in {0,1}. Returns (B, N, 2) float32 log-probs."""
    B, N = x.shape
    H = hidden_size
    if b_tile is None:
        b_tile = B
    assert B % b_tile == 0 and (b_tile == B or b_tile % 8 == 0)
    num_b = B // b_tile

    # --- glue (plain JAX): shift-right, time-major int spins -----------------
    x = x.astype(jnp.int32)
    x_shift = jnp.concatenate([jnp.zeros((B, 1), jnp.int32), x[:, :-1]], axis=1)
    x_tb = jnp.transpose(x_shift, (1, 0))[:, :, None]              # (T, B, 1)

    # Fold the combined LSTM bias into both rows of W_ih^T (exactly one row is
    # selected per step, so adding the bias to each row is equivalent).
    b = params["b_ih"] + params["b_hh"]                            # (4H,)
    wih_rows = params["w_ih"].T + b[None, :]                       # (2, 4H)
    whh_t = params["w_hh"].T                                       # (H, 4H)
    head_w = (params["w_lin"][1] - params["w_lin"][0]).reshape(1, 1, H)
    head_b = (params["b_lin"][1] - params["b_lin"][0]).reshape(1, 1, 1)

    out_tb = pl.pallas_call(
        lstm_logsoftmax_kernel,
        out_shape=jax.ShapeDtypeStruct((N, B, 2), jnp.float32),
        grid=(num_b,),
        in_specs=[
            pl.BlockSpec((N, b_tile, 1), lambda i: (0, i, 0)),     # spins
            pl.BlockSpec((2, 4 * H), lambda i: (0, 0)),            # W_ih rows (+bias)
            pl.BlockSpec((H, 4 * H), lambda i: (0, 0)),            # W_hh^T
            pl.BlockSpec((1, 1, H), lambda i: (0, 0, 0)),          # head weight diff
            pl.BlockSpec((1, 1, 1), lambda i: (0, 0, 0)),          # head bias diff
        ],
        out_specs=pl.BlockSpec((N, b_tile, 2), lambda i: (0, i, 0)),
        scratch_shapes=[
            pltpu.VMEM((b_tile, H), jnp.float32),                  # h
            pltpu.VMEM((b_tile, H), jnp.float32),                  # c
            pltpu.VMEM((N, b_tile, H), jnp.float32),               # all hidden states
        ],
        compiler_params=pltpu.CompilerParams(
            dimension_semantics=("parallel",)),                    # v7x: 2 TCs split batch
    )(x_tb, wih_rows, whh_t, head_w, head_b)

    return jnp.transpose(out_tb, (1, 0, 2))                        # (B, N, 2)


def init_params(key, hidden_size):
    """Deterministic init matching PyTorch LSTM/Linear param shapes."""
    H = hidden_size
    k = 1.0 / jnp.sqrt(jnp.float32(H))
    keys = jax.random.split(key, 6)
    uni = lambda kk, shape: jax.random.uniform(kk, shape, jnp.float32, -k, k)
    return {
        "w_ih": uni(keys[0], (4 * H, 2)),   # weight_ih_l0  (gate order i,f,g,o)
        "w_hh": uni(keys[1], (4 * H, H)),   # weight_hh_l0
        "b_ih": uni(keys[2], (4 * H,)),
        "b_hh": uni(keys[3], (4 * H,)),
        "w_lin": uni(keys[4], (2, H)),      # nn.Linear(H, 2).weight
        "b_lin": uni(keys[5], (2,)),
    }


def rnn1d_forward_ref(x, params, hidden_size):
    """Pure-JAX reference (same math as torch.nn.LSTM + Linear + LogSoftmax)."""
    B, N = x.shape
    H = hidden_size
    x_shift = jnp.concatenate(
        [jnp.zeros((B, 1), dtype=jnp.int32), x[:, :-1].astype(jnp.int32)], axis=1)
    x_oh = jax.nn.one_hot(x_shift, 2, dtype=jnp.float32)
    b = params["b_ih"] + params["b_hh"]

    def cell(carry, x_t):
        h, c = carry
        gates = x_t @ params["w_ih"].T + h @ params["w_hh"].T + b
        i = jax.nn.sigmoid(gates[:, 0 * H:1 * H])
        f = jax.nn.sigmoid(gates[:, 1 * H:2 * H])
        g = jnp.tanh(gates[:, 2 * H:3 * H])
        o = jax.nn.sigmoid(gates[:, 3 * H:4 * H])
        c = f * c + i * g
        h = o * jnp.tanh(c)
        return (h, c), h

    init = (jnp.zeros((B, H), jnp.float32), jnp.zeros((B, H), jnp.float32))
    _, hs = lax.scan(cell, init, jnp.transpose(x_oh, (1, 0, 2)))
    hs = jnp.transpose(hs, (1, 0, 2))                              # (B, N, H)
    logits = hs @ params["w_lin"].T + params["b_lin"]
    return jax.nn.log_softmax(logits, axis=-1)


if __name__ == "__main__":
    # Small shapes consistent with the module: Lx=4, Ly=2 -> N=8, batch=2.
    Lx, Ly = 4, 2
    N = Lx * Ly
    B = 2
    HIDDEN = 32

    key = jax.random.PRNGKey(0)
    k_x, k_p = jax.random.split(key)
    x = jax.random.randint(k_x, (B, N), 0, 2, dtype=jnp.int32)
    params = init_params(k_p, HIDDEN)

    out = rnn1d_forward(x, params, hidden_size=HIDDEN)
    out = jax.block_until_ready(out)

    ref = rnn1d_forward_ref(x, params, HIDDEN)
    assert out.shape == (B, N, 2)
    assert jnp.allclose(out, ref, atol=1e-4, rtol=1e-4), "mismatch vs JAX reference"

    # TODO(synk): sample() (autoregressive multinomial sampling) is not part of
    # forward() and is not implemented here.
    print("KERNEL_OK")
</pallas_src>

<mosaic_0001>
module attributes {stable_mosaic.version = 11 : i64} {
  func.func @lstm_logsoftmax_kernel(%arg0: i32, %arg1: memref<8x2x1xi32, #tpu.memory_space<vmem>>, %arg2: memref<2x128xf32, #tpu.memory_space<vmem>>, %arg3: memref<32x128xf32, #tpu.memory_space<vmem>>, %arg4: memref<1x1x32xf32, #tpu.memory_space<vmem>>, %arg5: memref<1x1x1xf32, #tpu.memory_space<vmem>>, %arg6: memref<8x2x2xf32, #tpu.memory_space<vmem>>, %arg7: memref<2x32xf32, #tpu.memory_space<vmem>>, %arg8: memref<2x32xf32, #tpu.memory_space<vmem>>, %arg9: memref<8x2x32xf32, #tpu.memory_space<vmem>>) attributes {dimension_semantics = [#tpu.dimension_semantics<parallel>], iteration_bounds = array<i64: 1>, scalar_prefetch = 0 : i64, scratch_operands = 3 : i64, tpu.core_type = #tpu.core_type<tc>, window_params = [{transform_indices = @transform_0, window_bounds = array<i64: 8, 2, 1>}, {pipeline_mode = #tpu.pipeline_mode<synchronous>, transform_indices = @transform_1, window_bounds = array<i64: 2, 128>}, {pipeline_mode = #tpu.pipeline_mode<synchronous>, transform_indices = @transform_2, window_bounds = array<i64: 32, 128>}, {pipeline_mode = #tpu.pipeline_mode<synchronous>, transform_indices = @transform_3, window_bounds = array<i64: 1, 1, 32>}, {pipeline_mode = #tpu.pipeline_mode<synchronous>, transform_indices = @transform_4, window_bounds = array<i64: 1, 1, 1>}, {transform_indices = @transform_5, window_bounds = array<i64: 8, 2, 2>}]} {
    %c0 = arith.constant 0 : index
    %c0_0 = arith.constant 0 : index
    %0 = vector.load %arg2[%c0, %c0_0] : memref<2x128xf32, #tpu.memory_space<vmem>>, vector<1x128xf32>
    %1 = vector.shape_cast %0 : vector<1x128xf32> to vector<1x128xf32>
    %2 = vector.broadcast %1 : vector<1x128xf32> to vector<2x128xf32>
    %c1 = arith.constant 1 : index
    %c0_1 = arith.constant 0 : index
    %3 = vector.load %arg2[%c1, %c0_1] : memref<2x128xf32, #tpu.memory_space<vmem>>, vector<1x128xf32>
    %4 = vector.shape_cast %3 : vector<1x128xf32> to vector<1x128xf32>
    %5 = vector.broadcast %4 : vector<1x128xf32> to vector<2x128xf32>
    %6 = tpu.iota {dimensions = array<i32: 1>} : vector<2x128xi32>
    %c64_i32 = arith.constant 64 : i32
    %7 = vector.broadcast %c64_i32 : i32 to vector<2x128xi32>
    %8 = arith.cmpi sge, %6, %7 : vector<2x128xi32>
    %c96_i32 = arith.constant 96 : i32
    %9 = vector.broadcast %c96_i32 : i32 to vector<2x128xi32>
    %10 = arith.cmpi slt, %6, %9 : vector<2x128xi32>
    %11 = arith.andi %8, %10 : vector<2x128xi1>
    %cst = arith.constant 0.000000e+00 : f32
    %12 = vector.broadcast %cst : f32 to vector<2x32xf32>
    %c0_2 = arith.constant 0 : index
    %c0_3 = arith.constant 0 : index
    %13 = vector.load %arg7[%c0_2, %c0_3] : memref<2x32xf32, #tpu.memory_space<vmem>>, vector<2x32xf32>
    tpu.vector_store %arg7[%c0_2, %c0_3], %12 {strides = array<i32>} : memref<2x32xf32, #tpu.memory_space<vmem>>, vector<2x32xf32>,
    %cst_4 = arith.constant 0.000000e+00 : f32
    %14 = vector.broadcast %cst_4 : f32 to vector<2x32xf32>
    %c0_5 = arith.constant 0 : index
    %c0_6 = arith.constant 0 : index
    %15 = vector.load %arg8[%c0_5, %c0_6] : memref<2x32xf32, #tpu.memory_space<vmem>>, vector<2x32xf32>
    tpu.vector_store %arg8[%c0_5, %c0_6], %14 {strides = array<i32>} : memref<2x32xf32, #tpu.memory_space<vmem>>, vector<2x32xf32>,
    %c0_i32 = arith.constant 0 : i32
    %16 = arith.index_cast %c0_i32 : i32 to index
    %c0_7 = arith.constant 0 : index
    %c0_8 = arith.constant 0 : index
    %17 = vector.load %arg1[%16, %c0_7, %c0_8] : memref<8x2x1xi32, #tpu.memory_space<vmem>>, vector<1x2x1xi32>
    %18 = vector.shape_cast %17 : vector<1x2x1xi32> to vector<2x1xi32>
    %c0_i32_9 = arith.constant 0 : i32
    %19 = vector.broadcast %c0_i32_9 : i32 to vector<2x1xi32>
    %20 = arith.cmpi sgt, %18, %19 : vector<2x1xi32>
    %21 = vector.shape_cast %20 : vector<2x1xi1> to vector<2x1xi1>
    %22 = vector.broadcast %21 : vector<2x1xi1> to vector<2x128xi1>
    %23 = arith.select %22, %5, %2 : vector<2x128xi1>, vector<2x128xf32>
    %c0_10 = arith.constant 0 : index
    %c0_11 = arith.constant 0 : index
    %24 = vector.load %arg7[%c0_10, %c0_11] : memref<2x32xf32, #tpu.memory_space<vmem>>, vector<2x32xf32>
    %c0_12 = arith.constant 0 : index
    %c0_13 = arith.constant 0 : index
    %25 = vector.load %arg3[%c0_12, %c0_13] : memref<32x128xf32, #tpu.memory_space<vmem>>, vector<32x128xf32>
    %cst_14 = arith.constant dense<0.000000e+00> : vector<2x128xf32>
    %26 = tpu.matmul %24, %25, %cst_14 {dimension_numbers = #tpu.dot_dimension_numbers<[1], [0], [0], [1], [0, 0, 1, 1], [], []>} : vector<2x32xf32>, vector<32x128xf32>, vector<2x128xf32> -> vector<2x128xf32>
    %27 = arith.addf %23, %26 : vector<2x128xf32>
    %28 = math.tanh %27 : vector<2x128xf32>
    %29 = arith.negf %27 : vector<2x128xf32>
    %30 = math.exp %29 : vector<2x128xf32>
    %cst_15 = arith.constant 1.000000e+00 : f32
    %31 = vector.broadcast %cst_15 : f32 to vector<2x128xf32>
    %32 = arith.addf %31, %30 : vector<2x128xf32>
    %33 = arith.divf %31, %32 : vector<2x128xf32>
    %34 = arith.select %11, %28, %33 : vector<2x128xi1>, vector<2x128xf32>
    %35 = vector.extract_strided_slice %34 {offsets = [0, 0], sizes = [2, 32], strides = [1, 1]} : vector<2x128xf32> to vector<2x32xf32>
    %36 = vector.extract_strided_slice %34 {offsets = [0, 32], sizes = [2, 32], strides = [1, 1]} : vector<2x128xf32> to vector<2x32xf32>
    %37 = vector.extract_strided_slice %34 {offsets = [0, 64], sizes = [2, 32], strides = [1, 1]} : vector<2x128xf32> to vector<2x32xf32>
    %38 = vector.extract_strided_slice %34 {offsets = [0, 96], sizes = [2, 32], strides = [1, 1]} : vector<2x128xf32> to vector<2x32xf32>
    %c0_16 = arith.constant 0 : index
    %c0_17 = arith.constant 0 : index
    %39 = vector.load %arg8[%c0_16, %c0_17] : memref<2x32xf32, #tpu.memory_space<vmem>>, vector<2x32xf32>
    %40 = arith.mulf %36, %39 : vector<2x32xf32>
    %41 = arith.mulf %35, %37 : vector<2x32xf32>
    %42 = arith.addf %40, %41 : vector<2x32xf32>
    %43 = math.tanh %42 : vector<2x32xf32>
    %44 = arith.mulf %38, %43 : vector<2x32xf32>
    %c0_18 = arith.constant 0 : index
    %c0_19 = arith.constant 0 : index
    %45 = vector.load %arg8[%c0_18, %c0_19] : memref<2x32xf32, #tpu.memory_space<vmem>>, vector<2x32xf32>
    tpu.vector_store %arg8[%c0_18, %c0_19], %42 {strides = array<i32>} : memref<2x32xf32, #tpu.memory_space<vmem>>, vector<2x32xf32>,
    %c0_20 = arith.constant 0 : index
    %c0_21 = arith.constant 0 : index
    %46 = vector.load %arg7[%c0_20, %c0_21] : memref<2x32xf32, #tpu.memory_space<vmem>>, vector<2x32xf32>
    tpu.vector_store %arg7[%c0_20, %c0_21], %44 {strides = array<i32>} : memref<2x32xf32, #tpu.memory_space<vmem>>, vector<2x32xf32>,
    %47 = arith.index_cast %c0_i32 : i32 to index
    %c0_22 = arith.constant 0 : index
    %c0_23 = arith.constant 0 : index
    %48 = vector.load %arg9[%47, %c0_22, %c0_23] : memref<8x2x32xf32, #tpu.memory_space<vmem>>, vector<1x2x32xf32>
    %49 = vector.shape_cast %48 : vector<1x2x32xf32> to vector<2x32xf32>
    %50 = vector.shape_cast %44 : vector<2x32xf32> to vector<1x2x32xf32>
    tpu.vector_store %arg9[%47, %c0_22, %c0_23], %50 {strides = array<i32>} : memref<8x2x32xf32, #tpu.memory_space<vmem>>, vector<1x2x32xf32>,
    %c1_i32 = arith.constant 1 : i32
    %51 = arith.index_cast %c1_i32 : i32 to index
    %c0_24 = arith.constant 0 : index
    %c0_25 = arith.constant 0 : index
    %52 = vector.load %arg1[%51, %c0_24, %c0_25] : memref<8x2x1xi32, #tpu.memory_space<vmem>>, vector<1x2x1xi32>
    %53 = vector.shape_cast %52 : vector<1x2x1xi32> to vector<2x1xi32>
    %c0_i32_26 = arith.constant 0 : i32
    %54 = vector.broadcast %c0_i32_26 : i32 to vector<2x1xi32>
    %55 = arith.cmpi sgt, %53, %54 : vector<2x1xi32>
    %56 = vector.shape_cast %55 : vector<2x1xi1> to vector<2x1xi1>
    %57 = vector.broadcast %56 : vector<2x1xi1> to vector<2x128xi1>
    %58 = arith.select %57, %5, %2 : vector<2x128xi1>, vector<2x128xf32>
    %c0_27 = arith.constant 0 : index
    %c0_28 = arith.constant 0 : index
    %59 = vector.load %arg7[%c0_27, %c0_28] : memref<2x32xf32, #tpu.memory_space<vmem>>, vector<2x32xf32>
    %c0_29 = arith.constant 0 : index
    %c0_30 = arith.constant 0 : index
    %60 = vector.load %arg3[%c0_29, %c0_30] : memref<32x128xf32, #tpu.memory_space<vmem>>, vector<32x128xf32>
    %cst_31 = arith.constant dense<0.000000e+00> : vector<2x128xf32>
    %61 = tpu.matmul %59, %60, %cst_31 {dimension_numbers = #tpu.dot_dimension_numbers<[1], [0], [0], [1], [0, 0, 1, 1], [], []>} : vector<2x32xf32>, vector<32x128xf32>, vector<2x128xf32> -> vector<2x128xf32>
    %62 = arith.addf %58, %61 : vector<2x128xf32>
    %63 = math.tanh %62 : vector<2x128xf32>
    %64 = arith.negf %62 : vector<2x128xf32>
    %65 = math.exp %64 : vector<2x128xf32>
    %cst_32 = arith.constant 1.000000e+00 : f32
    %66 = vector.broadcast %cst_32 : f32 to vector<2x128xf32>
    %67 = arith.addf %66, %65 : vector<2x128xf32>
    %68 = arith.divf %66, %67 : vector<2x128xf32>
    %69 = arith.select %11, %63, %68 : vector<2x128xi1>, vector<2x128xf32>
    %70 = vector.extract_strided_slice %69 {offsets = [0, 0], sizes = [2, 32], strides = [1, 1]} : vector<2x128xf32> to vector<2x32xf32>
    %71 = vector.extract_strided_slice %69 {offsets = [0, 32], sizes = [2, 32], strides = [1, 1]} : vector<2x128xf32> to vector<2x32xf32>
    %72 = vector.extract_strided_slice %69 {offsets = [0, 64], sizes = [2, 32], strides = [1, 1]} : vector<2x128xf32> to vector<2x32xf32>
    %73 = vector.extract_strided_slice %69 {offsets = [0, 96], sizes = [2, 32], strides = [1, 1]} : vector<2x128xf32> to vector<2x32xf32>
    %c0_33 = arith.constant 0 : index
    %c0_34 = arith.constant 0 : index
    %74 = vector.load %arg8[%c0_33, %c0_34] : memref<2x32xf32, #tpu.memory_space<vmem>>, vector<2x32xf32>
    %75 = arith.mulf %71, %74 : vector<2x32xf32>
    %76 = arith.mulf %70, %72 : vector<2x32xf32>
    %77 = arith.addf %75, %76 : vector<2x32xf32>
    %78 = math.tanh %77 : vector<2x32xf32>
    %79 = arith.mulf %73, %78 : vector<2x32xf32>
    %c0_35 = arith.constant 0 : index
    %c0_36 = arith.constant 0 : index
    %80 = vector.load %arg8[%c0_35, %c0_36] : memref<2x32xf32, #tpu.memory_space<vmem>>, vector<2x32xf32>
    tpu.vector_store %arg8[%c0_35, %c0_36], %77 {strides = array<i32>} : memref<2x32xf32, #tpu.memory_space<vmem>>, vector<2x32xf32>,
    %c0_37 = arith.constant 0 : index
    %c0_38 = arith.constant 0 : index
    %81 = vector.load %arg7[%c0_37, %c0_38] : memref<2x32xf32, #tpu.memory_space<vmem>>, vector<2x32xf32>
    tpu.vector_store %arg7[%c0_37, %c0_38], %79 {strides = array<i32>} : memref<2x32xf32, #tpu.memory_space<vmem>>, vector<2x32xf32>,
    %82 = arith.index_cast %c1_i32 : i32 to index
    %c0_39 = arith.constant 0 : index
    %c0_40 = arith.constant 0 : index
    %83 = vector.load %arg9[%82, %c0_39, %c0_40] : memref<8x2x32xf32, #tpu.memory_space<vmem>>, vector<1x2x32xf32>
    %84 = vector.shape_cast %83 : vector<1x2x32xf32> to vector<2x32xf32>
    %85 = vector.shape_cast %79 : vector<2x32xf32> to vector<1x2x32xf32>
    tpu.vector_store %arg9[%82, %c0_39, %c0_40], %85 {strides = array<i32>} : memref<8x2x32xf32, #tpu.memory_space<vmem>>, vector<1x2x32xf32>,
    %c2_i32 = arith.constant 2 : i32
    %86 = arith.index_cast %c2_i32 : i32 to index
    %c0_41 = arith.constant 0 : index
    %c0_42 = arith.constant 0 : index
    %87 = vector.load %arg1[%86, %c0_41, %c0_42] : memref<8x2x1xi32, #tpu.memory_space<vmem>>, vector<1x2x1xi32>
    %88 = vector.shape_cast %87 : vector<1x2x1xi32> to vector<2x1xi32>
    %c0_i32_43 = arith.constant 0 : i32
    %89 = vector.broadcast %c0_i32_43 : i32 to vector<2x1xi32>
    %90 = arith.cmpi sgt, %88, %89 : vector<2x1xi32>
    %91 = vector.shape_cast %90 : vector<2x1xi1> to vector<2x1xi1>
    %92 = vector.broadcast %91 : vector<2x1xi1> to vector<2x128xi1>
    %93 = arith.select %92, %5, %2 : vector<2x128xi1>, vector<2x128xf32>
    %c0_44 = arith.constant 0 : index
    %c0_45 = arith.constant 0 : index
    %94 = vector.load %arg7[%c0_44, %c0_45] : memref<2x32xf32, #tpu.memory_space<vmem>>, vector<2x32xf32>
    %c0_46 = arith.constant 0 : index
    %c0_47 = arith.constant 0 : index
    %95 = vector.load %arg3[%c0_46, %c0_47] : memref<32x128xf32, #tpu.memory_space<vmem>>, vector<32x128xf32>
    %cst_48 = arith.constant dense<0.000000e+00> : vector<2x128xf32>
    %96 = tpu.matmul %94, %95, %cst_48 {dimension_numbers = #tpu.dot_dimension_numbers<[1], [0], [0], [1], [0, 0, 1, 1], [], []>} : vector<2x32xf32>, vector<32x128xf32>, vector<2x128xf32> -> vector<2x128xf32>
    %97 = arith.addf %93, %96 : vector<2x128xf32>
    %98 = math.tanh %97 : vector<2x128xf32>
    %99 = arith.negf %97 : vector<2x128xf32>
    %100 = math.exp %99 : vector<2x128xf32>
    %cst_49 = arith.constant 1.000000e+00 : f32
    %101 = vector.broadcast %cst_49 : f32 to vector<2x128xf32>
    %102 = arith.addf %101, %100 : vector<2x128xf32>
    %103 = arith.divf %101, %102 : vector<2x128xf32>
    %104 = arith.select %11, %98, %103 : vector<2x128xi1>, vector<2x128xf32>
    %105 = vector.extract_strided_slice %104 {offsets = [0, 0], sizes = [2, 32], strides = [1, 1]} : vector<2x128xf32> to vector<2x32xf32>
    %106 = vector.extract_strided_slice %104 {offsets = [0, 32], sizes = [2, 32], strides = [1, 1]} : vector<2x128xf32> to vector<2x32xf32>
    %107 = vector.extract_strided_slice %104 {offsets = [0, 64], sizes = [2, 32], strides = [1, 1]} : vector<2x128xf32> to vector<2x32xf32>
    %108 = vector.extract_strided_slice %104 {offsets = [0, 96], sizes = [2, 32], strides = [1, 1]} : vector<2x128xf32> to vector<2x32xf32>
    %c0_50 = arith.constant 0 : index
    %c0_51 = arith.constant 0 : index
    %109 = vector.load %arg8[%c0_50, %c0_51] : memref<2x32xf32, #tpu.memory_space<vmem>>, vector<2x32xf32>
    %110 = arith.mulf %106, %109 : vector<2x32xf32>
    %111 = arith.mulf %105, %107 : vector<2x32xf32>
    %112 = arith.addf %110, %111 : vector<2x32xf32>
    %113 = math.tanh %112 : vector<2x32xf32>
    %114 = arith.mulf %108, %113 : vector<2x32xf32>
    %c0_52 = arith.constant 0 : index
    %c0_53 = arith.constant 0 : index
    %115 = vector.load %arg8[%c0_52, %c0_53] : memref<2x32xf32, #tpu.memory_space<vmem>>, vector<2x32xf32>
    tpu.vector_store %arg8[%c0_52, %c0_53], %112 {strides = array<i32>} : memref<2x32xf32, #tpu.memory_space<vmem>>, vector<2x32xf32>,
    %c0_54 = arith.constant 0 : index
    %c0_55 = arith.constant 0 : index
    %116 = vector.load %arg7[%c0_54, %c0_55] : memref<2x32xf32, #tpu.memory_space<vmem>>, vector<2x32xf32>
    tpu.vector_store %arg7[%c0_54, %c0_55], %114 {strides = array<i32>} : memref<2x32xf32, #tpu.memory_space<vmem>>, vector<2x32xf32>,
    %117 = arith.index_cast %c2_i32 : i32 to index
    %c0_56 = arith.constant 0 : index
    %c0_57 = arith.constant 0 : index
    %118 = vector.load %arg9[%117, %c0_56, %c0_57] : memref<8x2x32xf32, #tpu.memory_space<vmem>>, vector<1x2x32xf32>
    %119 = vector.shape_cast %118 : vector<1x2x32xf32> to vector<2x32xf32>
    %120 = vector.shape_cast %114 : vector<2x32xf32> to vector<1x2x32xf32>
    tpu.vector_store %arg9[%117, %c0_56, %c0_57], %120 {strides = array<i32>} : memref<8x2x32xf32, #tpu.memory_space<vmem>>, vector<1x2x32xf32>,
    %c3_i32 = arith.constant 3 : i32
    %121 = arith.index_cast %c3_i32 : i32 to index
    %c0_58 = arith.constant 0 : index
    %c0_59 = arith.constant 0 : index
    %122 = vector.load %arg1[%121, %c0_58, %c0_59] : memref<8x2x1xi32, #tpu.memory_space<vmem>>, vector<1x2x1xi32>
    %123 = vector.shape_cast %122 : vector<1x2x1xi32> to vector<2x1xi32>
    %c0_i32_60 = arith.constant 0 : i32
    %124 = vector.broadcast %c0_i32_60 : i32 to vector<2x1xi32>
    %125 = arith.cmpi sgt, %123, %124 : vector<2x1xi32>
    %126 = vector.shape_cast %125 : vector<2x1xi1> to vector<2x1xi1>
    %127 = vector.broadcast %126 : vector<2x1xi1> to vector<2x128xi1>
    %128 = arith.select %127, %5, %2 : vector<2x128xi1>, vector<2x128xf32>
    %c0_61 = arith.constant 0 : index
    %c0_62 = arith.constant 0 : index
    %129 = vector.load %arg7[%c0_61, %c0_62] : memref<2x32xf32, #tpu.memory_space<vmem>>, vector<2x32xf32>
    %c0_63 = arith.constant 0 : index
    %c0_64 = arith.constant 0 : index
    %130 = vector.load %arg3[%c0_63, %c0_64] : memref<32x128xf32, #tpu.memory_space<vmem>>, vector<32x128xf32>
    %cst_65 = arith.constant dense<0.000000e+00> : vector<2x128xf32>
    %131 = tpu.matmul %129, %130, %cst_65 {dimension_numbers = #tpu.dot_dimension_numbers<[1], [0], [0], [1], [0, 0, 1, 1], [], []>} : vector<2x32xf32>, vector<32x128xf32>, vector<2x128xf32> -> vector<2x128xf32>
    %132 = arith.addf %128, %131 : vector<2x128xf32>
    %133 = math.tanh %132 : vector<2x128xf32>
    %134 = arith.negf %132 : vector<2x128xf32>
    %135 = math.exp %134 : vector<2x128xf32>
    %cst_66 = arith.constant 1.000000e+00 : f32
    %136 = vector.broadcast %cst_66 : f32 to vector<2x128xf32>
    %137 = arith.addf %136, %135 : vector<2x128xf32>
    %138 = arith.divf %136, %137 : vector<2x128xf32>
    %139 = arith.select %11, %133, %138 : vector<2x128xi1>, vector<2x128xf32>
    %140 = vector.extract_strided_slice %139 {offsets = [0, 0], sizes = [2, 32], strides = [1, 1]} : vector<2x128xf32> to vector<2x32xf32>
    %141 = vector.extract_strided_slice %139 {offsets = [0, 32], sizes = [2, 32], strides = [1, 1]} : vector<2x128xf32> to vector<2x32xf32>
    %142 = vector.extract_strided_slice %139 {offsets = [0, 64], sizes = [2, 32], strides = [1, 1]} : vector<2x128xf32> to vector<2x32xf32>
    %143 = vector.extract_strided_slice %139 {offsets = [0, 96], sizes = [2, 32], strides = [1, 1]} : vector<2x128xf32> to vector<2x32xf32>
    %c0_67 = arith.constant 0 : index
    %c0_68 = arith.constant 0 : index
    %144 = vector.load %arg8[%c0_67, %c0_68] : memref<2x32xf32, #tpu.memory_space<vmem>>, vector<2x32xf32>
    %145 = arith.mulf %141, %144 : vector<2x32xf32>
    %146 = arith.mulf %140, %142 : vector<2x32xf32>
    %147 = arith.addf %145, %146 : vector<2x32xf32>
    %148 = math.tanh %147 : vector<2x32xf32>
    %149 = arith.mulf %143, %148 : vector<2x32xf32>
    %c0_69 = arith.constant 0 : index
    %c0_70 = arith.constant 0 : index
    %150 = vector.load %arg8[%c0_69, %c0_70] : memref<2x32xf32, #tpu.memory_space<vmem>>, vector<2x32xf32>
    tpu.vector_store %arg8[%c0_69, %c0_70], %147 {strides = array<i32>} : memref<2x32xf32, #tpu.memory_space<vmem>>, vector<2x32xf32>,
    %c0_71 = arith.constant 0 : index
    %c0_72 = arith.constant 0 : index
    %151 = vector.load %arg7[%c0_71, %c0_72] : memref<2x32xf32, #tpu.memory_space<vmem>>, vector<2x32xf32>
    tpu.vector_store %arg7[%c0_71, %c0_72], %149 {strides = array<i32>} : memref<2x32xf32, #tpu.memory_space<vmem>>, vector<2x32xf32>,
    %152 = arith.index_cast %c3_i32 : i32 to index
    %c0_73 = arith.constant 0 : index
    %c0_74 = arith.constant 0 : index
    %153 = vector.load %arg9[%152, %c0_73, %c0_74] : memref<8x2x32xf32, #tpu.memory_space<vmem>>, vector<1x2x32xf32>
    %154 = vector.shape_cast %153 : vector<1x2x32xf32> to vector<2x32xf32>
    %155 = vector.shape_cast %149 : vector<2x32xf32> to vector<1x2x32xf32>
    tpu.vector_store %arg9[%152, %c0_73, %c0_74], %155 {strides = array<i32>} : memref<8x2x32xf32, #tpu.memory_space<vmem>>, vector<1x2x32xf32>,
    %c4_i32 = arith.constant 4 : i32
    %156 = arith.index_cast %c4_i32 : i32 to index
    %c0_75 = arith.constant 0 : index
    %c0_76 = arith.constant 0 : index
    %157 = vector.load %arg1[%156, %c0_75, %c0_76] : memref<8x2x1xi32, #tpu.memory_space<vmem>>, vector<1x2x1xi32>
    %158 = vector.shape_cast %157 : vector<1x2x1xi32> to vector<2x1xi32>
    %c0_i32_77 = arith.constant 0 : i32
    %159 = vector.broadcast %c0_i32_77 : i32 to vector<2x1xi32>
    %160 = arith.cmpi sgt, %158, %159 : vector<2x1xi32>
    %161 = vector.shape_cast %160 : vector<2x1xi1> to vector<2x1xi1>
    %162 = vector.broadcast %161 : vector<2x1xi1> to vector<2x128xi1>
    %163 = arith.select %162, %5, %2 : vector<2x128xi1>, vector<2x128xf32>
    %c0_78 = arith.constant 0 : index
    %c0_79 = arith.constant 0 : index
    %164 = vector.load %arg7[%c0_78, %c0_79] : memref<2x32xf32, #tpu.memory_space<vmem>>, vector<2x32xf32>
    %c0_80 = arith.constant 0 : index
    %c0_81 = arith.constant 0 : index
    %165 = vector.load %arg3[%c0_80, %c0_81] : memref<32x128xf32, #tpu.memory_space<vmem>>, vector<32x128xf32>
    %cst_82 = arith.constant dense<0.000000e+00> : vector<2x128xf32>
    %166 = tpu.matmul %164, %165, %cst_82 {dimension_numbers = #tpu.dot_dimension_numbers<[1], [0], [0], [1], [0, 0, 1, 1], [], []>} : vector<2x32xf32>, vector<32x128xf32>, vector<2x128xf32> -> vector<2x128xf32>
    %167 = arith.addf %163, %166 : vector<2x128xf32>
    %168 = math.tanh %167 : vector<2x128xf32>
    %169 = arith.negf %167 : vector<2x128xf32>
    %170 = math.exp %169 : vector<2x128xf32>
    %cst_83 = arith.constant 1.000000e+00 : f32
    %171 = vector.broadcast %cst_83 : f32 to vector<2x128xf32>
    %172 = arith.addf %171, %170 : vector<2x128xf32>
    %173 = arith.divf %171, %172 : vector<2x128xf32>
    %174 = arith.select %11, %168, %173 : vector<2x128xi1>, vector<2x128xf32>
    %175 = vector.extract_strided_slice %174 {offsets = [0, 0], sizes = [2, 32], strides = [1, 1]} : vector<2x128xf32> to vector<2x32xf32>
    %176 = vector.extract_strided_slice %174 {offsets = [0, 32], sizes = [2, 32], strides = [1, 1]} : vector<2x128xf32> to vector<2x32xf32>
    %177 = vector.extract_strided_slice %174 {offsets = [0, 64], sizes = [2, 32], strides = [1, 1]} : vector<2x128xf32> to vector<2x32xf32>
    %178 = vector.extract_strided_slice %174 {offsets = [0, 96], sizes = [2, 32], strides = [1, 1]} : vector<2x128xf32> to vector<2x32xf32>
    %c0_84 = arith.constant 0 : index
    %c0_85 = arith.constant 0 : index
    %179 = vector.load %arg8[%c0_84, %c0_85] : memref<2x32xf32, #tpu.memory_space<vmem>>, vector<2x32xf32>
    %180 = arith.mulf %176, %179 : vector<2x32xf32>
    %181 = arith.mulf %175, %177 : vector<2x32xf32>
    %182 = arith.addf %180, %181 : vector<2x32xf32>
    %183 = math.tanh %182 : vector<2x32xf32>
    %184 = arith.mulf %178, %183 : vector<2x32xf32>
    %c0_86 = arith.constant 0 : index
    %c0_87 = arith.constant 0 : index
    %185 = vector.load %arg8[%c0_86, %c0_87] : memref<2x32xf32, #tpu.memory_space<vmem>>, vector<2x32xf32>
    tpu.vector_store %arg8[%c0_86, %c0_87], %182 {strides = array<i32>} : memref<2x32xf32, #tpu.memory_space<vmem>>, vector<2x32xf32>,
    %c0_88 = arith.constant 0 : index
    %c0_89 = arith.constant 0 : index
    %186 = vector.load %arg7[%c0_88, %c0_89] : memref<2x32xf32, #tpu.memory_space<vmem>>, vector<2x32xf32>
    tpu.vector_store %arg7[%c0_88, %c0_89], %184 {strides = array<i32>} : memref<2x32xf32, #tpu.memory_space<vmem>>, vector<2x32xf32>,
    %187 = arith.index_cast %c4_i32 : i32 to index
    %c0_90 = arith.constant 0 : index
    %c0_91 = arith.constant 0 : index
    %188 = vector.load %arg9[%187, %c0_90, %c0_91] : memref<8x2x32xf32, #tpu.memory_space<vmem>>, vector<1x2x32xf32>
    %189 = vector.shape_cast %188 : vector<1x2x32xf32> to vector<2x32xf32>
    %190 = vector.shape_cast %184 : vector<2x32xf32> to vector<1x2x32xf32>
    tpu.vector_store %arg9[%187, %c0_90, %c0_91], %190 {strides = array<i32>} : memref<8x2x32xf32, #tpu.memory_space<vmem>>, vector<1x2x32xf32>,
    %c5_i32 = arith.constant 5 : i32
    %191 = arith.index_cast %c5_i32 : i32 to index
    %c0_92 = arith.constant 0 : index
    %c0_93 = arith.constant 0 : index
    %192 = vector.load %arg1[%191, %c0_92, %c0_93] : memref<8x2x1xi32, #tpu.memory_space<vmem>>, vector<1x2x1xi32>
    %193 = vector.shape_cast %192 : vector<1x2x1xi32> to vector<2x1xi32>
    %c0_i32_94 = arith.constant 0 : i32
    %194 = vector.broadcast %c0_i32_94 : i32 to vector<2x1xi32>
    %195 = arith.cmpi sgt, %193, %194 : vector<2x1xi32>
    %196 = vector.shape_cast %195 : vector<2x1xi1> to vector<2x1xi1>
    %197 = vector.broadcast %196 : vector<2x1xi1> to vector<2x128xi1>
    %198 = arith.select %197, %5, %2 : vector<2x128xi1>, vector<2x128xf32>
    %c0_95 = arith.constant 0 : index
    %c0_96 = arith.constant 0 : index
    %199 = vector.load %arg7[%c0_95, %c0_96] : memref<2x32xf32, #tpu.memory_space<vmem>>, vector<2x32xf32>
    %c0_97 = arith.constant 0 : index
    %c0_98 = arith.constant 0 : index
    %200 = vector.load %arg3[%c0_97, %c0_98] : memref<32x128xf32, #tpu.memory_space<vmem>>, vector<32x128xf32>
    %cst_99 = arith.constant dense<0.000000e+00> : vector<2x128xf32>
    %201 = tpu.matmul %199, %200, %cst_99 {dimension_numbers = #tpu.dot_dimension_numbers<[1], [0], [0], [1], [0, 0, 1, 1], [], []>} : vector<2x32xf32>, vector<32x128xf32>, vector<2x128xf32> -> vector<2x128xf32>
    %202 = arith.addf %198, %201 : vector<2x128xf32>
    %203 = math.tanh %202 : vector<2x128xf32>
    %204 = arith.negf %202 : vector<2x128xf32>
    %205 = math.exp %204 : vector<2x128xf32>
    %cst_100 = arith.constant 1.000000e+00 : f32
    %206 = vector.broadcast %cst_100 : f32 to vector<2x128xf32>
    %207 = arith.addf %206, %205 : vector<2x128xf32>
    %208 = arith.divf %206, %207 : vector<2x128xf32>
    %209 = arith.select %11, %203, %208 : vector<2x128xi1>, vector<2x128xf32>
    %210 = vector.extract_strided_slice %209 {offsets = [0, 0], sizes = [2, 32], strides = [1, 1]} : vector<2x128xf32> to vector<2x32xf32>
    %211 = vector.extract_strided_slice %209 {offsets = [0, 32], sizes = [2, 32], strides = [1, 1]} : vector<2x128xf32> to vector<2x32xf32>
    %212 = vector.extract_strided_slice %209 {offsets = [0, 64], sizes = [2, 32], strides = [1, 1]} : vector<2x128xf32> to vector<2x32xf32>
    %213 = vector.extract_strided_slice %209 {offsets = [0, 96], sizes = [2, 32], strides = [1, 1]} : vector<2x128xf32> to vector<2x32xf32>
    %c0_101 = arith.constant 0 : index
    %c0_102 = arith.constant 0 : index
    %214 = vector.load %arg8[%c0_101, %c0_102] : memref<2x32xf32, #tpu.memory_space<vmem>>, vector<2x32xf32>
    %215 = arith.mulf %211, %214 : vector<2x32xf32>
    %216 = arith.mulf %210, %212 : vector<2x32xf32>
    %217 = arith.addf %215, %216 : vector<2x32xf32>
    %218 = math.tanh %217 : vector<2x32xf32>
    %219 = arith.mulf %213, %218 : vector<2x32xf32>
    %c0_103 = arith.constant 0 : index
    %c0_104 = arith.constant 0 : index
    %220 = vector.load %arg8[%c0_103, %c0_104] : memref<2x32xf32, #tpu.memory_space<vmem>>, vector<2x32xf32>
    tpu.vector_store %arg8[%c0_103, %c0_104], %217 {strides = array<i32>} : memref<2x32xf32, #tpu.memory_space<vmem>>, vector<2x32xf32>,
    %c0_105 = arith.constant 0 : index
    %c0_106 = arith.constant 0 : index
    %221 = vector.load %arg7[%c0_105, %c0_106] : memref<2x32xf32, #tpu.memory_space<vmem>>, vector<2x32xf32>
    tpu.vector_store %arg7[%c0_105, %c0_106], %219 {strides = array<i32>} : memref<2x32xf32, #tpu.memory_space<vmem>>, vector<2x32xf32>,
    %222 = arith.index_cast %c5_i32 : i32 to index
    %c0_107 = arith.constant 0 : index
    %c0_108 = arith.constant 0 : index
    %223 = vector.load %arg9[%222, %c0_107, %c0_108] : memref<8x2x32xf32, #tpu.memory_space<vmem>>, vector<1x2x32xf32>
    %224 = vector.shape_cast %223 : vector<1x2x32xf32> to vector<2x32xf32>
    %225 = vector.shape_cast %219 : vector<2x32xf32> to vector<1x2x32xf32>
    tpu.vector_store %arg9[%222, %c0_107, %c0_108], %225 {strides = array<i32>} : memref<8x2x32xf32, #tpu.memory_space<vmem>>, vector<1x2x32xf32>,
    %c6_i32 = arith.constant 6 : i32
    %226 = arith.index_cast %c6_i32 : i32 to index
    %c0_109 = arith.constant 0 : index
    %c0_110 = arith.constant 0 : index
    %227 = vector.load %arg1[%226, %c0_109, %c0_110] : memref<8x2x1xi32, #tpu.memory_space<vmem>>, vector<1x2x1xi32>
    %228 = vector.shape_cast %227 : vector<1x2x1xi32> to vector<2x1xi32>
    %c0_i32_111 = arith.constant 0 : i32
    %229 = vector.broadcast %c0_i32_111 : i32 to vector<2x1xi32>
    %230 = arith.cmpi sgt, %228, %229 : vector<2x1xi32>
    %231 = vector.shape_cast %230 : vector<2x1xi1> to vector<2x1xi1>
    %232 = vector.broadcast %231 : vector<2x1xi1> to vector<2x128xi1>
    %233 = arith.select %232, %5, %2 : vector<2x128xi1>, vector<2x128xf32>
    %c0_112 = arith.constant 0 : index
    %c0_113 = arith.constant 0 : index
    %234 = vector.load %arg7[%c0_112, %c0_113] : memref<2x32xf32, #tpu.memory_space<vmem>>, vector<2x32xf32>
    %c0_114 = arith.constant 0 : index
    %c0_115 = arith.constant 0 : index
    %235 = vector.load %arg3[%c0_114, %c0_115] : memref<32x128xf32, #tpu.memory_space<vmem>>, vector<32x128xf32>
    %cst_116 = arith.constant dense<0.000000e+00> : vector<2x128xf32>
    %236 = tpu.matmul %234, %235, %cst_116 {dimension_numbers = #tpu.dot_dimension_numbers<[1], [0], [0], [1], [0, 0, 1, 1], [], []>} : vector<2x32xf32>, vector<32x128xf32>, vector<2x128xf32> -> vector<2x128xf32>
    %237 = arith.addf %233, %236 : vector<2x128xf32>
    %238 = math.tanh %237 : vector<2x128xf32>
    %239 = arith.negf %237 : vector<2x128xf32>
    %240 = math.exp %239 : vector<2x128xf32>
    %cst_117 = arith.constant 1.000000e+00 : f32
    %241 = vector.broadcast %cst_117 : f32 to vector<2x128xf32>
    %242 = arith.addf %241, %240 : vector<2x128xf32>
    %243 = arith.divf %241, %242 : vector<2x128xf32>
    %244 = arith.select %11, %238, %243 : vector<2x128xi1>, vector<2x128xf32>
    %245 = vector.extract_strided_slice %244 {offsets = [0, 0], sizes = [2, 32], strides = [1, 1]} : vector<2x128xf32> to vector<2x32xf32>
    %246 = vector.extract_strided_slice %244 {offsets = [0, 32], sizes = [2, 32], strides = [1, 1]} : vector<2x128xf32> to vector<2x32xf32>
    %247 = vector.extract_strided_slice %244 {offsets = [0, 64], sizes = [2, 32], strides = [1, 1]} : vector<2x128xf32> to vector<2x32xf32>
    %248 = vector.extract_strided_slice %244 {offsets = [0, 96], sizes = [2, 32], strides = [1, 1]} : vector<2x128xf32> to vector<2x32xf32>
    %c0_118 = arith.constant 0 : index
    %c0_119 = arith.constant 0 : index
    %249 = vector.load %arg8[%c0_118, %c0_119] : memref<2x32xf32, #tpu.memory_space<vmem>>, vector<2x32xf32>
    %250 = arith.mulf %246, %249 : vector<2x32xf32>
    %251 = arith.mulf %245, %247 : vector<2x32xf32>
    %252 = arith.addf %250, %251 : vector<2x32xf32>
    %253 = math.tanh %252 : vector<2x32xf32>
    %254 = arith.mulf %248, %253 : vector<2x32xf32>
    %c0_120 = arith.constant 0 : index
    %c0_121 = arith.constant 0 : index
    %255 = vector.load %arg8[%c0_120, %c0_121] : memref<2x32xf32, #tpu.memory_space<vmem>>, vector<2x32xf32>
    tpu.vector_store %arg8[%c0_120, %c0_121], %252 {strides = array<i32>} : memref<2x32xf32, #tpu.memory_space<vmem>>, vector<2x32xf32>,
    %c0_122 = arith.constant 0 : index
    %c0_123 = arith.constant 0 : index
    %256 = vector.load %arg7[%c0_122, %c0_123] : memref<2x32xf32, #tpu.memory_space<vmem>>, vector<2x32xf32>
    tpu.vector_store %arg7[%c0_122, %c0_123], %254 {strides = array<i32>} : memref<2x32xf32, #tpu.memory_space<vmem>>, vector<2x32xf32>,
    %257 = arith.index_cast %c6_i32 : i32 to index
    %c0_124 = arith.constant 0 : index
    %c0_125 = arith.constant 0 : index
    %258 = vector.load %arg9[%257, %c0_124, %c0_125] : memref<8x2x32xf32, #tpu.memory_space<vmem>>, vector<1x2x32xf32>
    %259 = vector.shape_cast %258 : vector<1x2x32xf32> to vector<2x32xf32>
    %260 = vector.shape_cast %254 : vector<2x32xf32> to vector<1x2x32xf32>
    tpu.vector_store %arg9[%257, %c0_124, %c0_125], %260 {strides = array<i32>} : memref<8x2x32xf32, #tpu.memory_space<vmem>>, vector<1x2x32xf32>,
    %c7_i32 = arith.constant 7 : i32
    %261 = arith.index_cast %c7_i32 : i32 to index
    %c0_126 = arith.constant 0 : index
    %c0_127 = arith.constant 0 : index
    %262 = vector.load %arg1[%261, %c0_126, %c0_127] : memref<8x2x1xi32, #tpu.memory_space<vmem>>, vector<1x2x1xi32>
    %263 = vector.shape_cast %262 : vector<1x2x1xi32> to vector<2x1xi32>
    %c0_i32_128 = arith.constant 0 : i32
    %264 = vector.broadcast %c0_i32_128 : i32 to vector<2x1xi32>
    %265 = arith.cmpi sgt, %263, %264 : vector<2x1xi32>
    %266 = vector.shape_cast %265 : vector<2x1xi1> to vector<2x1xi1>
    %267 = vector.broadcast %266 : vector<2x1xi1> to vector<2x128xi1>
    %268 = arith.select %267, %5, %2 : vector<2x128xi1>, vector<2x128xf32>
    %c0_129 = arith.constant 0 : index
    %c0_130 = arith.constant 0 : index
    %269 = vector.load %arg7[%c0_129, %c0_130] : memref<2x32xf32, #tpu.memory_space<vmem>>, vector<2x32xf32>
    %c0_131 = arith.constant 0 : index
    %c0_132 = arith.constant 0 : index
    %270 = vector.load %arg3[%c0_131, %c0_132] : memref<32x128xf32, #tpu.memory_space<vmem>>, vector<32x128xf32>
    %cst_133 = arith.constant dense<0.000000e+00> : vector<2x128xf32>
    %271 = tpu.matmul %269, %270, %cst_133 {dimension_numbers = #tpu.dot_dimension_numbers<[1], [0], [0], [1], [0, 0, 1, 1], [], []>} : vector<2x32xf32>, vector<32x128xf32>, vector<2x128xf32> -> vector<2x128xf32>
    %272 = arith.addf %268, %271 : vector<2x128xf32>
    %273 = math.tanh %272 : vector<2x128xf32>
    %274 = arith.negf %272 : vector<2x128xf32>
    %275 = math.exp %274 : vector<2x128xf32>
    %cst_134 = arith.constant 1.000000e+00 : f32
    %276 = vector.broadcast %cst_134 : f32 to vector<2x128xf32>
    %277 = arith.addf %276, %275 : vector<2x128xf32>
    %278 = arith.divf %276, %277 : vector<2x128xf32>
    %279 = arith.select %11, %273, %278 : vector<2x128xi1>, vector<2x128xf32>
    %280 = vector.extract_strided_slice %279 {offsets = [0, 0], sizes = [2, 32], strides = [1, 1]} : vector<2x128xf32> to vector<2x32xf32>
    %281 = vector.extract_strided_slice %279 {offsets = [0, 32], sizes = [2, 32], strides = [1, 1]} : vector<2x128xf32> to vector<2x32xf32>
    %282 = vector.extract_strided_slice %279 {offsets = [0, 64], sizes = [2, 32], strides = [1, 1]} : vector<2x128xf32> to vector<2x32xf32>
    %283 = vector.extract_strided_slice %279 {offsets = [0, 96], sizes = [2, 32], strides = [1, 1]} : vector<2x128xf32> to vector<2x32xf32>
    %c0_135 = arith.constant 0 : index
    %c0_136 = arith.constant 0 : index
    %284 = vector.load %arg8[%c0_135, %c0_136] : memref<2x32xf32, #tpu.memory_space<vmem>>, vector<2x32xf32>
    %285 = arith.mulf %281, %284 : vector<2x32xf32>
    %286 = arith.mulf %280, %282 : vector<2x32xf32>
    %287 = arith.addf %285, %286 : vector<2x32xf32>
    %288 = math.tanh %287 : vector<2x32xf32>
    %289 = arith.mulf %283, %288 : vector<2x32xf32>
    %c0_137 = arith.constant 0 : index
    %c0_138 = arith.constant 0 : index
    %290 = vector.load %arg8[%c0_137, %c0_138] : memref<2x32xf32, #tpu.memory_space<vmem>>, vector<2x32xf32>
    tpu.vector_store %arg8[%c0_137, %c0_138], %287 {strides = array<i32>} : memref<2x32xf32, #tpu.memory_space<vmem>>, vector<2x32xf32>,
    %c0_139 = arith.constant 0 : index
    %c0_140 = arith.constant 0 : index
    %291 = vector.load %arg7[%c0_139, %c0_140] : memref<2x32xf32, #tpu.memory_space<vmem>>, vector<2x32xf32>
    tpu.vector_store %arg7[%c0_139, %c0_140], %289 {strides = array<i32>} : memref<2x32xf32, #tpu.memory_space<vmem>>, vector<2x32xf32>,
    %292 = arith.index_cast %c7_i32 : i32 to index
    %c0_141 = arith.constant 0 : index
    %c0_142 = arith.constant 0 : index
    %293 = vector.load %arg9[%292, %c0_141, %c0_142] : memref<8x2x32xf32, #tpu.memory_space<vmem>>, vector<1x2x32xf32>
    %294 = vector.shape_cast %293 : vector<1x2x32xf32> to vector<2x32xf32>
    %295 = vector.shape_cast %289 : vector<2x32xf32> to vector<1x2x32xf32>
    tpu.vector_store %arg9[%292, %c0_141, %c0_142], %295 {strides = array<i32>} : memref<8x2x32xf32, #tpu.memory_space<vmem>>, vector<1x2x32xf32>,
    %c8_i32 = arith.constant 8 : i32
    %c0_143 = arith.constant 0 : index
    %c0_144 = arith.constant 0 : index
    %c0_145 = arith.constant 0 : index
    %296 = vector.load %arg9[%c0_143, %c0_144, %c0_145] : memref<8x2x32xf32, #tpu.memory_space<vmem>>, vector<8x2x32xf32>
    %c0_146 = arith.constant 0 : index
    %c0_147 = arith.constant 0 : index
    %c0_148 = arith.constant 0 : index
    %297 = vector.load %arg4[%c0_146, %c0_147, %c0_148] : memref<1x1x32xf32, #tpu.memory_space<vmem>>, vector<1x1x32xf32>
    %298 = vector.broadcast %297 : vector<1x1x32xf32> to vector<8x2x32xf32>
    %299 = arith.mulf %296, %298 : vector<8x2x32xf32>
    %cst_149 = arith.constant dense<0.000000e+00> : vector<8x2xf32>
    %300 = vector.multi_reduction <add>, %299, %cst_149 [2] : vector<8x2x32xf32> to vector<8x2xf32>
    %301 = vector.shape_cast %300 : vector<8x2xf32> to vector<8x2x1xf32>
    %c0_150 = arith.constant 0 : index
    %c0_151 = arith.constant 0 : index
    %c0_152 = arith.constant 0 : index
    %302 = vector.load %arg5[%c0_150, %c0_151, %c0_152] : memref<1x1x1xf32, #tpu.memory_space<vmem>>, vector<1x1x1xf32>
    %303 = vector.broadcast %302 : vector<1x1x1xf32> to vector<8x2x1xf32>
    %304 = arith.addf %301, %303 : vector<8x2x1xf32>
    %305 = math.absf %304 : vector<8x2x1xf32>
    %cst_153 = arith.constant 0.000000e+00 : f32
    %306 = vector.broadcast %cst_153 : f32 to vector<8x2x1xf32>
    %307 = arith.subf %306, %305 : vector<8x2x1xf32>
    %308 = math.exp %307 : vector<8x2x1xf32>
    %cst_154 = arith.constant 1.000000e+00 : f32
    %309 = vector.broadcast %cst_154 : f32 to vector<8x2x1xf32>
    %310 = arith.addf %309, %308 : vector<8x2x1xf32>
    %311 = math.log %310 : vector<8x2x1xf32>
    %cst_155 = arith.constant 0.000000e+00 : f32
    %312 = vector.broadcast %cst_155 : f32 to vector<8x2x1xf32>
    %313 = arith.subf %312, %304 : vector<8x2x1xf32>
    %cst_156 = arith.constant 0.000000e+00 : f32
    %314 = vector.broadcast %cst_156 : f32 to vector<8x2x1xf32>
    %315 = arith.maximumf %313, %314 : vector<8x2x1xf32>
    %316 = arith.addf %315, %311 : vector<8x2x1xf32>
    %cst_157 = arith.constant 0.000000e+00 : f32
    %317 = vector.broadcast %cst_157 : f32 to vector<8x2x1xf32>
    %318 = arith.subf %317, %316 : vector<8x2x1xf32>
    %cst_158 = arith.constant 0.000000e+00 : f32
    %319 = vector.broadcast %cst_158 : f32 to vector<8x2x1xf32>
    %320 = arith.maximumf %304, %319 : vector<8x2x1xf32>
    %321 = arith.addf %320, %311 : vector<8x2x1xf32>
    %cst_159 = arith.constant 0.000000e+00 : f32
    %322 = vector.broadcast %cst_159 : f32 to vector<8x2x1xf32>
    %323 = arith.subf %322, %321 : vector<8x2x1xf32>
    %324 = tpu.iota {dimensions = array<i32: 2>} : vector<8x2x2xi32>
    %c0_i32_160 = arith.constant 0 : i32
    %325 = vector.broadcast %c0_i32_160 : i32 to vector<8x2x2xi32>
    %326 = arith.cmpi eq, %324, %325 : vector<8x2x2xi32>
    %327 = vector.shape_cast %323 : vector<8x2x1xf32> to vector<8x2x1xf32>
    %328 = vector.broadcast %327 : vector<8x2x1xf32> to vector<8x2x2xf32>
    %329 = vector.shape_cast %318 : vector<8x2x1xf32> to vector<8x2x1xf32>
    %330 = vector.broadcast %329 : vector<8x2x1xf32> to vector<8x2x2xf32>
    %331 = arith.select %326, %328, %330 : vector<8x2x2xi1>, vector<8x2x2xf32>
    %c0_161 = arith.constant 0 : index
    %c0_162 = arith.constant 0 : index
    %c0_163 = arith.constant 0 : index
    %332 = vector.load %arg6[%c0_161, %c0_162, %c0_163] : memref<8x2x2xf32, #tpu.memory_space<vmem>>, vector<8x2x2xf32>
    tpu.vector_store %arg6[%c0_161, %c0_162, %c0_163], %331 {strides = array<i32>} : memref<8x2x2xf32, #tpu.memory_space<vmem>>, vector<8x2x2xf32>,
    return
  }
  func.func @transform_0(%arg0: i32) -> (i32, i32, i32) {
    %c0_i32 = arith.constant 0 : i32
    %c0_i32_0 = arith.constant 0 : i32
    %c0_i32_1 = arith.constant 0 : i32
    return %c0_i32, %arg0, %c0_i32_0 : i32, i32, i32
  }
  func.func @transform_1(%arg0: i32) -> (i32, i32) {
    %c0_i32 = arith.constant 0 : i32
    %c0_i32_0 = arith.constant 0 : i32
    %c0_i32_1 = arith.constant 0 : i32
    return %c0_i32, %c0_i32_0 : i32, i32
  }
  func.func @transform_2(%arg0: i32) -> (i32, i32) {
    %c0_i32 = arith.constant 0 : i32
    %c0_i32_0 = arith.constant 0 : i32
    %c0_i32_1 = arith.constant 0 : i32
    return %c0_i32, %c0_i32_0 : i32, i32
  }
  func.func @transform_3(%arg0: i32) -> (i32, i32, i32) {
    %c0_i32 = arith.constant 0 : i32
    %c0_i32_0 = arith.constant 0 : i32
    %c0_i32_1 = arith.constant 0 : i32
    %c0_i32_2 = arith.constant 0 : i32
    return %c0_i32, %c0_i32_0, %c0_i32_1 : i32, i32, i32
  }
  func.func @transform_4(%arg0: i32) -> (i32, i32, i32) {
    %c0_i32 = arith.constant 0 : i32
    %c0_i32_0 = arith.constant 0 : i32
    %c0_i32_1 = arith.constant 0 : i32
    %c0_i32_2 = arith.constant 0 : i32
    return %c0_i32, %c0_i32_0, %c0_i32_1 : i32, i32, i32
  }
  func.func @transform_5(%arg0: i32) -> (i32, i32, i32) {
    %c0_i32 = arith.constant 0 : i32
    %c0_i32_0 = arith.constant 0 : i32
    %c0_i32_1 = arith.constant 0 : i32
    return %c0_i32, %arg0, %c0_i32_0 : i32, i32, i32
  }
}

</mosaic_0001>

<bundles_post_ra>
// kernel: rnn1d_forward.1
= control target key start
LH: loop header
LB: loop body
LE: loop exit
PB: predicated region body
PF: predicated region fallthrough
CT: control target
= control target key end

     0   :  { %vm37_vm0 = vcmask 254976   ;;  %v1614_v0 = vmov 0.0   ;;  %vm1615_vm1 = vmmov 0   ;;  %v1616_v3 = vmov 0   ;;  %s1619_s9 = smov 96   ;;  %s2024_s2 = inlined_call_operand.vmem [shape: f32[32,128], index: 2, kind: input, shape index: {}]   ;;  %s2025_s0 = inlined_call_operand.vmem [shape: s32[8,2,1], index: 0, kind: input, shape index: {}]   ;;  %s2026_s1 = inlined_call_operand.vmem [shape: f32[2,128], index: 1, kind: input, shape index: {}]   ;;  %s2027_s3 = inlined_call_operand.vmem [shape: f32[1,1,32], index: 3, kind: input, shape index: {}]   ;;  %s2028_s4 = inlined_call_operand.<no memory space> [shape: f32[1,1,1], index: 4, kind: input, shape index: {}]   ;;  %s2029_s5 = inlined_call_operand.vmem [shape: f32[8,2,2], index: 5, kind: output, shape index: {}]  }
   0x1   :  { %1422 = vmatprep.subr.mxu0 %v1614_v0  ;;  %v1654_v1 = vld [vmem:[%s2024_s2 + $0x18] sm:$0xff]  ;;  %v1659_v2 = vld [vmem:[%s2024_s2 + $0x10] sm:$0xff]  ;;  %1430 = vmatprep.mubr.msk.f32.mxu0 %vm1615_vm1, %v1614_v0  ;;  %38 = vst.msk [vmem:[#allocation2] sm:$0x3] %vm37_vm0, %v1614_v0  ;;  %39 = vst.msk [vmem:[#allocation3] sm:$0x3] %vm37_vm0, %v1614_v0  ;;  %v32_v20 = vlaneseq }
   0x2   :  { %1423 = vmatpush3.msra.mxu0 %v1654_v1  ;;  %1516 = vset.pattern.permute.xlu0 %v1616_v3  ;;  %v40_v4 = vld [vmem:[%s2025_s0] sm:$0x3]  ;;  %v1676_v5 = vld [vmem:[%s2024_s2 + $0x8] sm:$0xff]  ;;  %vm53_vm3 = vcmask 261120   ;;  %v1359_v32 = vld [vmem:[%s2025_s0 + $0x2] sm:$0x3] }
   0x3   :  { %1424 = vmatprep.subr.mxu0 %v1614_v0  ;;  %vm41_vm2 = vcmp.gt.s32.totalorder %v40_v4, 0  ;;  %1433 = vmatprep.subr.mxu1 %v1614_v0  ;;  %v1686_v7 = vld [vmem:[%s2024_s2] sm:$0xff]  ;;  %s1617_s2 = smov 32   ;;  %v1726_v21 = vand.u32 127, %v32_v20  ;;  %vm171_vm8 = vcmp.gt.s32.totalorder %v1359_v32, 0 }
   0x4   :  { %1425 = vmatpush3.msra.mxu0 %v1659_v2  ;;  %v42_v6 = vsel %vm41_vm2, 1, %v1616_v3  ;;  %1434 = vmatpush3.msra.mxu1 %v1654_v1  ;;  %v1717_v11 = vld [vmem:[%s2026_s1] ss:$0 sm:$0xff]  ;;  %v1722_v12 = vld [vmem:[%s2026_s1 + $0x1] ss:$0 sm:$0xff]  ;;  %s1618_s1 = smov 64  }
   0x5   :  { %1426 = vmatprep.subr.mxu0 %v1614_v0  ;;  %44 = vperm.xlu0 %1516, %v42_v6   ;;  %vm34_vm5 = vcmp.ge.s32.totalorder %v1726_v21, 64  ;;  %vm35_vm6 = vcmp.lt.s32.totalorder %v1726_v21, 96  ;;  %v172_v34 = vsel %vm171_vm8, 1, %v1616_v3  ;;  %v1362_v61 = vld [vmem:[%s2025_s0 + $0x4] sm:$0x3] }
   0x6   :  { %1427 = vmatpush3.msra.mxu0 %v1676_v5  ;;  %1435 = vmatprep.subr.mxu1 %v1614_v0  ;;  %vm1730_vm7 = vmand %vm34_vm5, %vm35_vm6  ;;  %vm301_vm10 = vcmp.gt.s32.totalorder %v1362_v61, 0  ;;  %v1380_v22 = vld [vmem:[%s2027_s3] ss:$0 sm:$0xff] }
   0x7   :  { %1428 = vmatprep.subr.mxu0 %v1614_v0  ;;  %1436 = vmatpush3.msra.mxu1 %v1659_v2  ;;  %v302_v62 = vsel %vm301_vm10, 1, %v1616_v3 }
   0x8   :  { %1429 = vmatpush3.msra.mxu0 %v1686_v7  ;;  %v48_v8 = vld [vmem:[#allocation2] sm:$0x3]  ;;  %v136_v9 = vld [vmem:[#allocation3] sm:$0x3]  ;;  %1437 = vmatprep.subr.mxu1 %v1614_v0 }
   0x9   :  { %1431 = vmatmul.mubr.msk.f32.vlgmr.msra.gmra.mxu0 %vm53_vm3, %v48_v8  ;;  %138 = vrot.lane.b32.xlu1 %v136_v9, %s1617_s2 }
   0xa   :  { %1438 = vmatpush3.msra.mxu1 %v1676_v5  ;;  %1441 = vmatprep.mubr.msk.f32.mxu1 %vm1615_vm1, %v1614_v0 }
   0xb   :  { %1439 = vmatprep.subr.mxu1 %v1614_v0  ;;  %1444 = vmatprep.subr.mxu0 %v1614_v0 }
   0xc   :  { %1440 = vmatpush3.msra.mxu1 %v1686_v7  ;;  %1445 = vmatpush3.msra.mxu0 %v1654_v1 }
   0xd   :  { %1446 = vmatprep.subr.mxu0 %v1614_v0  ;;  %1452 = vmatprep.mubr.msk.f32.mxu0 %vm1615_vm1, %v1614_v0 }
   0xe   :  { %1447 = vmatpush3.msra.mxu0 %v1659_v2  ;;  %1517 = vset.pattern.permute.xlu1 %v1616_v3 }
   0xf   :  { %1448 = vmatprep.subr.mxu0 %v1614_v0  ;;  %1455 = vmatprep.subr.mxu1 %v1614_v0 }
  0x10   :  { %1449 = vmatpush3.msra.mxu0 %v1676_v5 }
  0x11   :  { %1450 = vmatprep.subr.mxu0 %v1614_v0 }
  0x12   :  { %1451 = vmatpush3.msra.mxu0 %v1686_v7 }
  0x13   :  { %1466 = vmatprep.subr.mxu0 %v1614_v0 }
  0x7b   :  { %v139_v28 = vpop.permute.xlu1 %138 }
  0x80   :  { %v45_v10 = vpop.permute.xlu0 %44 }
  0x81   :  { %vm46_vm4 = vcmp.eq.s32.totalorder %v45_v10, 1 }
  0x82   :  { %v47_v13 = vsel %vm46_vm4, %v1722_v12, %v1717_v11 }
  0xc9   :  { %v123_v14 = vpop.f32.mrf.mxu0 }
  0xca   :  { %v127_v15 = vadd.f32 %v123_v14, %v47_v13 }
  0xcb   :  { %v1432_v16 = vpop.f32.mrf.mxu0 }
  0xcc   :  { %v1358_v17 = vmul.f32 -1.442695, %v127_v15 }
  0xce   :  { %1518 = vpow2.f32 %v1358_v17 }
  0xcf   :  { %1520 = vtanh.f32 %v127_v15 }
  0xdb   :  { %v1519_v18 = vpop.eup %1518 }
  0xdc   :  { %v132_v19 = vadd.f32 1.0, %v1519_v18  ;;  %v1521_v23 = vpop.eup %1520 }
  0xde   :  { %1522 = vrcp.f32 %v132_v19 }
  0xeb   :  { %v1523_v24 = vpop.eup %1522 }
  0xec   :  { %v135_v25 = vsel %vm1730_vm7, %v1521_v23, %v1523_v24 }
  0xed   :  { %143 = vrot.lane.b32.xlu0 %v135_v25, %s1618_s1  ;;  %v141_v29 = vmul.f32 %v139_v28, %v135_v25 }
 0x15f   :  { %v144_v26 = vpop.permute.xlu0 %143 }
 0x160   :  { %v146_v27 = vmul.f32 %v144_v26, %v135_v25 }
 0x162   :  { %148 = vrot.lane.b32.xlu1 %v146_v27, %s1617_s2 }
 0x1d4   :  { %v149_v30 = vpop.permute.xlu1 %148 }
 0x1d5   :  { %v151_v31 = vadd.f32 %v149_v30, %v141_v29  ;;  %v1365_v30 = vld [vmem:[%s2025_s0 + $0x6] sm:$0x3] }
 0x1d6   :  { %vm431_vm12 = vcmp.gt.s32.totalorder %v1365_v30, 0 }
 0x1d7   :  { %1524 = vtanh.f32 %v151_v31  ;;  %v432_v32 = vsel %vm431_vm12, 1, %v1616_v3 }
 0x1e4   :  { %v1525_v33 = vpop.eup %1524 }
 0x1e5   :  { %154 = vrot.lane.b32.xlu0 %v1525_v33, %s1618_s1 }
 0x1e9   :  { %174 = vperm.xlu0 %1516, %v172_v34  }
 0x257   :  { %v155_v35 = vpop.permute.xlu0 %154 }
 0x258   :  { %v157_v36 = vmul.f32 %v155_v35, %v135_v25 }
 0x25a   :  { %164 = vrot.lane.b32.xlu1 %v157_v36, %s1617_s2 }
 0x25e   :  { %159 = vrot.lane.b32.xlu1 %v151_v31, %s1619_s9 }
 0x264   :  { %v175_v41 = vpop.permute.xlu0 %174 }
 0x265   :  { %vm176_vm9 = vcmp.eq.s32.totalorder %v175_v41, 1 }
 0x266   :  { %v177_v42 = vsel %vm176_vm9, %v1722_v12, %v1717_v11 }
 0x2cc   :  { %v165_v37 = vpop.permute.xlu1 %164 }
 0x2cd   :  { %167 = vst.msk [vmem:[#allocation2] sm:$0x3] %vm37_vm0, %v165_v37  ;;  %168 = vst.msk [vmem:[#allocation4] sm:$0x3] %vm37_vm0, %v165_v37 }
 0x2d0   :  { %v160_v38 = vpop.permute.xlu1 %159 }
 0x2d1   :  { %162 = vst.msk [vmem:[#allocation3] sm:$0x3] %vm37_vm0, %v160_v38 }
 0x2d4   :  { %v178_v39 = vld [vmem:[#allocation2] sm:$0x3] }
 0x2d5   :  { %1442 = vmatmul.mubr.msk.f32.vlgmr.msra.gmra.mxu1 %vm53_vm3, %v178_v39 }
 0x2d6   :  { %1456 = vmatpush3.msra.mxu1 %v1654_v1  ;;  %1463 = vmatprep.mubr.msk.f32.mxu1 %vm1615_vm1, %v1614_v0 }
 0x2d7   :  { %1457 = vmatprep.subr.mxu1 %v1614_v0 }
 0x2d8   :  { %v265_v40 = vld [vmem:[#allocation3] sm:$0x3]  ;;  %1458 = vmatpush3.msra.mxu1 %v1659_v2 }
 0x2d9   :  { %267 = vrot.lane.b32.xlu1 %v265_v40, %s1617_s2  ;;  %1459 = vmatprep.subr.mxu1 %v1614_v0 }
 0x2da   :  { %1460 = vmatpush3.msra.mxu1 %v1676_v5 }
 0x2db   :  { %1461 = vmatprep.subr.mxu1 %v1614_v0 }
 0x2dc   :  { %1462 = vmatpush3.msra.mxu1 %v1686_v7 }
 0x2dd   :  { %1477 = vmatprep.subr.mxu1 %v1614_v0 }
 0x34b   :  { %v268_v54 = vpop.permute.xlu1 %267 }
 0x395   :  { %v252_v43 = vpop.f32.mrf.mxu1 }
 0x396   :  { %v256_v44 = vadd.f32 %v252_v43, %v177_v42 }
 0x397   :  { %v1443_v45 = vpop.f32.mrf.mxu1 }
 0x398   :  { %v1361_v46 = vmul.f32 -1.442695, %v256_v44 }
 0x39a   :  { %1526 = vpow2.f32 %v1361_v46 }
 0x39b   :  { %1528 = vtanh.f32 %v256_v44 }
 0x3a7   :  { %v1527_v47 = vpop.eup %1526 }
 0x3a8   :  { %v261_v48 = vadd.f32 1.0, %v1527_v47  ;;  %v1529_v49 = vpop.eup %1528 }
 0x3aa   :  { %1530 = vrcp.f32 %v261_v48 }
 0x3b7   :  { %v1531_v50 = vpop.eup %1530 }
 0x3b8   :  { %v264_v51 = vsel %vm1730_vm7, %v1529_v49, %v1531_v50 }
 0x3b9   :  { %272 = vrot.lane.b32.xlu0 %v264_v51, %s1618_s1  ;;  %v270_v55 = vmul.f32 %v268_v54, %v264_v51 }
 0x42b   :  { %v273_v52 = vpop.permute.xlu0 %272 }
 0x42c   :  { %v275_v53 = vmul.f32 %v273_v52, %v264_v51 }
 0x42e   :  { %277 = vrot.lane.b32.xlu0 %v275_v53, %s1617_s2 }
 0x4a0   :  { %v278_v56 = vpop.permute.xlu0 %277 }
 0x4a1   :  { %v280_v57 = vadd.f32 %v278_v56, %v270_v55  ;;  %v1368_v56 = vld [vmem:[%s2025_s0 + $0x8] sm:$0x3] }
 0x4a2   :  { %vm561_vm14 = vcmp.gt.s32.totalorder %v1368_v56, 0 }
 0x4a3   :  { %1532 = vtanh.f32 %v280_v57 }
 0x4b0   :  { %v1533_v58 = vpop.eup %1532 }
 0x4b1   :  { %283 = vrot.lane.b32.xlu1 %v1533_v58, %s1618_s1  ;;  %v562_v58 = vsel %vm561_vm14, 1, %v1616_v3 }
 0x4b5   :  { %304 = vperm.xlu1 %1517, %v302_v62  }
 0x523   :  { %v284_v59 = vpop.permute.xlu1 %283 }
 0x524   :  { %v286_v60 = vmul.f32 %v284_v59, %v264_v51 }
 0x526   :  { %293 = vrot.lane.b32.xlu0 %v286_v60, %s1617_s2 }
 0x52a   :  { %288 = vrot.lane.b32.xlu0 %v280_v57, %s1619_s9 }
 0x530   :  { %v305_v9 = vpop.permute.xlu1 %304 }
 0x531   :  { %vm306_vm11 = vcmp.eq.s32.totalorder %v305_v9, 1 }
 0x532   :  { %v307_v10 = vsel %vm306_vm11, %v1722_v12, %v1717_v11 }
 0x598   :  { %v294_v63 = vpop.permute.xlu0 %293 }
 0x599   :  { %296 = vst.msk [vmem:[#allocation2] sm:$0x3] %vm37_vm0, %v294_v63  ;;  %298 = vst.msk [vmem:[#allocation4 + $0x2] sm:$0x3] %vm37_vm0, %v294_v63 }
 0x59c   :  { %v289_v4 = vpop.permute.xlu0 %288 }
 0x59d   :  { %291 = vst.msk [vmem:[#allocation3] sm:$0x3] %vm37_vm0, %v289_v4 }
 0x5a0   :  { %v308_v6 = vld [vmem:[#allocation2] sm:$0x3] }
 0x5a1   :  { %1453 = vmatmul.mubr.msk.f32.vlgmr.msra.gmra.mxu0 %vm53_vm3, %v308_v6 }
 0x5a2   :  { %1467 = vmatpush3.msra.mxu0 %v1654_v1  ;;  %1474 = vmatprep.mubr.msk.f32.mxu0 %vm1615_vm1, %v1614_v0 }
 0x5a3   :  { %1468 = vmatprep.subr.mxu0 %v1614_v0 }
 0x5a4   :  { %v395_v8 = vld [vmem:[#allocation3] sm:$0x3]  ;;  %1469 = vmatpush3.msra.mxu0 %v1659_v2 }
 0x5a5   :  { %397 = vrot.lane.b32.xlu0 %v395_v8, %s1617_s2  ;;  %1470 = vmatprep.subr.mxu0 %v1614_v0 }
 0x5a6   :  { %1471 = vmatpush3.msra.mxu0 %v1676_v5 }
 0x5a7   :  { %1472 = vmatprep.subr.mxu0 %v1614_v0 }
 0x5a8   :  { %1473 = vmatpush3.msra.mxu0 %v1686_v7 }
 0x5a9   :  { %1488 = vmatprep.subr.mxu0 %v1614_v0 }
 0x617   :  { %v398_v26 = vpop.permute.xlu0 %397 }
 0x661   :  { %v382_v13 = vpop.f32.mrf.mxu0 }
 0x662   :  { %v386_v14 = vadd.f32 %v382_v13, %v307_v10 }
 0x663   :  { %v1454_v15 = vpop.f32.mrf.mxu0 }
 0x664   :  { %v1364_v16 = vmul.f32 -1.442695, %v386_v14 }
 0x666   :  { %1534 = vpow2.f32 %v1364_v16 }
 0x667   :  { %1536 = vtanh.f32 %v386_v14 }
 0x673   :  { %v1535_v17 = vpop.eup %1534 }
 0x674   :  { %v391_v18 = vadd.f32 1.0, %v1535_v17  ;;  %v1537_v19 = vpop.eup %1536 }
 0x676   :  { %1538 = vrcp.f32 %v391_v18 }
 0x683   :  { %v1539_v20 = vpop.eup %1538 }
 0x684   :  { %v394_v23 = vsel %vm1730_vm7, %v1537_v19, %v1539_v20 }
 0x685   :  { %402 = vrot.lane.b32.xlu1 %v394_v23, %s1618_s1  ;;  %v400_v27 = vmul.f32 %v398_v26, %v394_v23 }
 0x6f7   :  { %v403_v24 = vpop.permute.xlu1 %402 }
 0x6f8   :  { %v405_v25 = vmul.f32 %v403_v24, %v394_v23 }
 0x6fa   :  { %407 = vrot.lane.b32.xlu1 %v405_v25, %s1617_s2 }
 0x76c   :  { %v408_v28 = vpop.permute.xlu1 %407 }
 0x76d   :  { %v410_v29 = vadd.f32 %v408_v28, %v400_v27  ;;  %v1371_v28 = vld [vmem:[%s2025_s0 + $0xa] sm:$0x3] }
 0x76e   :  { %vm691_vm2 = vcmp.gt.s32.totalorder %v1371_v28, 0 }
 0x76f   :  { %1540 = vtanh.f32 %v410_v29  ;;  %v692_v30 = vsel %vm691_vm2, 1, %v1616_v3 }
 0x77c   :  { %v1541_v31 = vpop.eup %1540 }
 0x77d   :  { %413 = vrot.lane.b32.xlu0 %v1541_v31, %s1618_s1 }
 0x781   :  { %434 = vperm.xlu0 %1516, %v432_v32  }
 0x7ef   :  { %v414_v33 = vpop.permute.xlu0 %413 }
 0x7f0   :  { %v416_v34 = vmul.f32 %v414_v33, %v394_v23 }
 0x7f2   :  { %423 = vrot.lane.b32.xlu1 %v416_v34, %s1617_s2 }
 0x7f6   :  { %418 = vrot.lane.b32.xlu1 %v410_v29, %s1619_s9 }
 0x7fc   :  { %v435_v39 = vpop.permute.xlu0 %434 }
 0x7fd   :  { %vm436_vm13 = vcmp.eq.s32.totalorder %v435_v39, 1 }
 0x7fe   :  { %v437_v40 = vsel %vm436_vm13, %v1722_v12, %v1717_v11 }
 0x864   :  { %v424_v35 = vpop.permute.xlu1 %423 }
 0x865   :  { %426 = vst.msk [vmem:[#allocation2] sm:$0x3] %vm37_vm0, %v424_v35  ;;  %428 = vst.msk [vmem:[#allocation4 + $0x4] sm:$0x3] %vm37_vm0, %v424_v35 }
 0x868   :  { %v419_v36 = vpop.permute.xlu1 %418 }
 0x869   :  { %421 = vst.msk [vmem:[#allocation3] sm:$0x3] %vm37_vm0, %v419_v36 }
 0x86c   :  { %v438_v37 = vld [vmem:[#allocation2] sm:$0x3] }
 0x86d   :  { %1464 = vmatmul.mubr.msk.f32.vlgmr.msra.gmra.mxu1 %vm53_vm3, %v438_v37 }
 0x86e   :  { %1478 = vmatpush3.msra.mxu1 %v1654_v1  ;;  %1485 = vmatprep.mubr.msk.f32.mxu1 %vm1615_vm1, %v1614_v0 }
 0x86f   :  { %1479 = vmatprep.subr.mxu1 %v1614_v0 }
 0x870   :  { %v525_v38 = vld [vmem:[#allocation3] sm:$0x3]  ;;  %1480 = vmatpush3.msra.mxu1 %v1659_v2 }
 0x871   :  { %527 = vrot.lane.b32.xlu1 %v525_v38, %s1617_s2  ;;  %1481 = vmatprep.subr.mxu1 %v1614_v0 }
 0x872   :  { %1482 = vmatpush3.msra.mxu1 %v1676_v5 }
 0x873   :  { %1483 = vmatprep.subr.mxu1 %v1614_v0 }
 0x874   :  { %1484 = vmatpush3.msra.mxu1 %v1686_v7 }
 0x875   :  { %1499 = vmatprep.subr.mxu1 %v1614_v0 }
 0x8e3   :  { %v528_v52 = vpop.permute.xlu1 %527 }
 0x92d   :  { %v512_v41 = vpop.f32.mrf.mxu1 }
 0x92e   :  { %v516_v42 = vadd.f32 %v512_v41, %v437_v40 }
 0x92f   :  { %v1465_v43 = vpop.f32.mrf.mxu1 }
 0x930   :  { %v1367_v44 = vmul.f32 -1.442695, %v516_v42 }
 0x932   :  { %1542 = vpow2.f32 %v1367_v44 }
 0x933   :  { %1544 = vtanh.f32 %v516_v42 }
 0x93f   :  { %v1543_v45 = vpop.eup %1542 }
 0x940   :  { %v521_v46 = vadd.f32 1.0, %v1543_v45  ;;  %v1545_v47 = vpop.eup %1544 }
 0x942   :  { %1546 = vrcp.f32 %v521_v46 }
 0x94f   :  { %v1547_v48 = vpop.eup %1546 }
 0x950   :  { %v524_v49 = vsel %vm1730_vm7, %v1545_v47, %v1547_v48 }
 0x951   :  { %532 = vrot.lane.b32.xlu0 %v524_v49, %s1618_s1  ;;  %v530_v53 = vmul.f32 %v528_v52, %v524_v49 }
 0x9c3   :  { %v533_v50 = vpop.permute.xlu0 %532 }
 0x9c4   :  { %v535_v51 = vmul.f32 %v533_v50, %v524_v49 }
 0x9c6   :  { %537 = vrot.lane.b32.xlu0 %v535_v51, %s1617_s2 }
 0xa38   :  { %v538_v54 = vpop.permute.xlu0 %537 }
 0xa39   :  { %v540_v55 = vadd.f32 %v538_v54, %v530_v53 }
 0xa3b   :  { %1548 = vtanh.f32 %v540_v55 }
 0xa48   :  { %v1549_v57 = vpop.eup %1548 }
 0xa49   :  { %543 = vrot.lane.b32.xlu1 %v1549_v57, %s1618_s1 }
 0xa4d   :  { %564 = vperm.xlu1 %1517, %v562_v58  }
 0xabb   :  { %v544_v59 = vpop.permute.xlu1 %543 }
 0xabc   :  { %v546_v60 = vmul.f32 %v544_v59, %v524_v49  ;;  %v1374_v49 = vld [vmem:[%s2025_s0 + $0xc] sm:$0x3] }
 0xabe   :  { %553 = vrot.lane.b32.xlu0 %v546_v60, %s1617_s2 }
 0xac2   :  { %548 = vrot.lane.b32.xlu0 %v540_v55, %s1619_s9 }
 0xac8   :  { %v565_v6 = vpop.permute.xlu1 %564 }
 0xac9   :  { %vm566_vm15 = vcmp.eq.s32.totalorder %v565_v6, 1 }
 0xaca   :  { %v567_v8 = vsel %vm566_vm15, %v1722_v12, %v1717_v11 }
 0xb30   :  { %v554_v61 = vpop.permute.xlu0 %553 }
 0xb31   :  { %556 = vst.msk [vmem:[#allocation2] sm:$0x3] %vm37_vm0, %v554_v61  ;;  %558 = vst.msk [vmem:[#allocation4 + $0x6] sm:$0x3] %vm37_vm0, %v554_v61 }
 0xb34   :  { %v549_v62 = vpop.permute.xlu0 %548 }
 0xb35   :  { %551 = vst.msk [vmem:[#allocation3] sm:$0x3] %vm37_vm0, %v549_v62 }
 0xb38   :  { %v568_v63 = vld [vmem:[#allocation2] sm:$0x3] }
 0xb39   :  { %1475 = vmatmul.mubr.msk.f32.vlgmr.msra.gmra.mxu0 %vm53_vm3, %v568_v63 }
 0xb3a   :  { %1489 = vmatpush3.msra.mxu0 %v1654_v1  ;;  %1496 = vmatprep.mubr.msk.f32.mxu0 %vm1615_vm1, %v1614_v0 }
 0xb3b   :  { %1490 = vmatprep.subr.mxu0 %v1614_v0 }
 0xb3c   :  { %v655_v4 = vld [vmem:[#allocation3] sm:$0x3]  ;;  %1491 = vmatpush3.msra.mxu0 %v1659_v2 }
 0xb3d   :  { %657 = vrot.lane.b32.xlu0 %v655_v4, %s1617_s2  ;;  %1492 = vmatprep.subr.mxu0 %v1614_v0 }
 0xb3e   :  { %1493 = vmatpush3.msra.mxu0 %v1676_v5 }
 0xb3f   :  { %1494 = vmatprep.subr.mxu0 %v1614_v0 }
 0xb40   :  { %1495 = vmatpush3.msra.mxu0 %v1686_v7 }
 0xbaf   :  { %v658_v24 = vpop.permute.xlu0 %657 }
 0xbf9   :  { %v642_v9 = vpop.f32.mrf.mxu0 }
 0xbfa   :  { %v646_v10 = vadd.f32 %v642_v9, %v567_v8 }
 0xbfb   :  { %v1476_v13 = vpop.f32.mrf.mxu0 }
 0xbfc   :  { %v1370_v14 = vmul.f32 -1.442695, %v646_v10 }
 0xbfe   :  { %1550 = vpow2.f32 %v1370_v14 }
 0xbff   :  { %1552 = vtanh.f32 %v646_v10 }
 0xc0b   :  { %v1551_v15 = vpop.eup %1550 }
 0xc0c   :  { %v651_v16 = vadd.f32 1.0, %v1551_v15  ;;  %v1553_v17 = vpop.eup %1552 }
 0xc0e   :  { %1554 = vrcp.f32 %v651_v16 }
 0xc1b   :  { %v1555_v18 = vpop.eup %1554 }
 0xc1c   :  { %v654_v19 = vsel %vm1730_vm7, %v1553_v17, %v1555_v18 }
 0xc1d   :  { %662 = vrot.lane.b32.xlu1 %v654_v19, %s1618_s1  ;;  %v660_v25 = vmul.f32 %v658_v24, %v654_v19 }
 0xc8f   :  { %v663_v20 = vpop.permute.xlu1 %662 }
 0xc90   :  { %v665_v23 = vmul.f32 %v663_v20, %v654_v19 }
 0xc92   :  { %667 = vrot.lane.b32.xlu1 %v665_v23, %s1617_s2 }
 0xd04   :  { %v668_v26 = vpop.permute.xlu1 %667 }
 0xd05   :  { %v670_v27 = vadd.f32 %v668_v26, %v660_v25 }
 0xd07   :  { %1556 = vtanh.f32 %v670_v27 }
 0xd14   :  { %v1557_v29 = vpop.eup %1556 }
 0xd15   :  { %673 = vrot.lane.b32.xlu0 %v1557_v29, %s1618_s1 }
 0xd19   :  { %694 = vperm.xlu0 %1516, %v692_v30  }
 0xd87   :  { %v674_v31 = vpop.permute.xlu0 %673 }
 0xd88   :  { %v676_v32 = vmul.f32 %v674_v31, %v654_v19  ;;  %v1377_v19 = vld [vmem:[%s2025_s0 + $0xe] sm:$0x3] }
 0xd89   :  { %vm951_vm6 = vcmp.gt.s32.totalorder %v1377_v19, 0 }
 0xd8a   :  { %683 = vrot.lane.b32.xlu1 %v676_v32, %s1617_s2  ;;  %v952_v23 = vsel %vm951_vm6, 1, %v1616_v3 }
 0xd8e   :  { %678 = vrot.lane.b32.xlu1 %v670_v27, %s1619_s9 }
 0xd94   :  { %v695_v37 = vpop.permute.xlu0 %694 }
 0xd95   :  { %vm696_vm4 = vcmp.eq.s32.totalorder %v695_v37, 1 }
 0xdfc   :  { %v684_v33 = vpop.permute.xlu1 %683 }
 0xdfd   :  { %686 = vst.msk [vmem:[#allocation2] sm:$0x3] %vm37_vm0, %v684_v33  ;;  %688 = vst.msk [vmem:[#allocation4 + $0x8] sm:$0x3] %vm37_vm0, %v684_v33 }
 0xe00   :  { %v679_v34 = vpop.permute.xlu1 %678 }
 0xe01   :  { %681 = vst.msk [vmem:[#allocation3] sm:$0x3] %vm37_vm0, %v679_v34 }
 0xe04   :  { %v698_v35 = vld [vmem:[#allocation2] sm:$0x3] }
 0xe05   :  { %1486 = vmatmul.mubr.msk.f32.vlgmr.msra.gmra.mxu1 %vm53_vm3, %v698_v35 }
 0xe06   :  { %1500 = vmatpush3.msra.mxu1 %v1654_v1  ;;  %1507 = vmatprep.mubr.msk.f32.mxu1 %vm1615_vm1, %v1614_v0  ;;  %v697_v1 = vsel %vm696_vm4, %v1722_v12, %v1717_v11  ;;  %vm821_vm1 = vcmp.gt.s32.totalorder %v1374_v49, 0 }
 0xe07   :  { %1501 = vmatprep.subr.mxu1 %v1614_v0  ;;  %v822_v51 = vsel %vm821_vm1, 1, %v1616_v3 }
 0xe08   :  { %v785_v36 = vld [vmem:[#allocation3] sm:$0x3]  ;;  %1502 = vmatpush3.msra.mxu1 %v1659_v2 }
 0xe09   :  { %787 = vrot.lane.b32.xlu1 %v785_v36, %s1617_s2  ;;  %1503 = vmatprep.subr.mxu1 %v1614_v0 }
 0xe0a   :  { %1504 = vmatpush3.msra.mxu1 %v1676_v5 }
 0xe0b   :  { %1505 = vmatprep.subr.mxu1 %v1614_v0 }
 0xe0c   :  { %1506 = vmatpush3.msra.mxu1 %v1686_v7 }
 0xe7b   :  { %v788_v45 = vpop.permute.xlu1 %787 }
 0xec5   :  { %v772_v38 = vpop.f32.mrf.mxu1 }
 0xec6   :  { %v776_v39 = vadd.f32 %v772_v38, %v697_v1 }
 0xec7   :  { %v1487_v40 = vpop.f32.mrf.mxu1 }
 0xec8   :  { %v1373_v41 = vmul.f32 -1.442695, %v776_v39 }
 0xeca   :  { %1558 = vpow2.f32 %v1373_v41 }
 0xecb   :  { %1560 = vtanh.f32 %v776_v39 }
 0xed7   :  { %v1559_v2 = vpop.eup %1558 }
 0xed8   :  { %v781_v42 = vadd.f32 1.0, %v1559_v2  ;;  %v1561_v43 = vpop.eup %1560 }
 0xeda   :  { %1562 = vrcp.f32 %v781_v42 }
 0xee7   :  { %v1563_v5 = vpop.eup %1562 }
 0xee8   :  { %v784_v0 = vsel %vm1730_vm7, %v1561_v43, %v1563_v5  ;;  %v1079_v43 = vld [vmem:[#allocation4] sm:$0x3] }
 0xee9   :  { %792 = vrot.lane.b32.xlu0 %v784_v0, %s1618_s1  ;;  %v790_v46 = vmul.f32 %v788_v45, %v784_v0  ;;  %v1094_v5 = vmul.f32 %v1380_v22, %v1079_v43 }
 0xf5b   :  { %v793_v7 = vpop.permute.xlu0 %792 }
 0xf5c   :  { %v795_v44 = vmul.f32 %v793_v7, %v784_v0  ;;  %v10_v7 = vstv %s2028_s4 }
 0xf5d   :  { %11 = vst [vmem:[#allocation5] sm:$0x1] %v10_v7 }
 0xf5e   :  { %797 = vrot.lane.b32.xlu0 %v795_v44, %s1617_s2  ;;  %v1102_v44 = vsel %vm37_vm0, %v1094_v5, 0.0 }
 0xfd0   :  { %v798_v47 = vpop.permute.xlu0 %797 }
 0xfd1   :  { %v800_v48 = vadd.f32 %v798_v47, %v790_v46 }
 0xfd3   :  { %1564 = vtanh.f32 %v800_v48 }
 0xfe0   :  { %v1565_v50 = vpop.eup %1564 }
 0xfe1   :  { %803 = vrot.lane.b32.xlu1 %v1565_v50, %s1618_s1 }
 0xfe5   :  { %824 = vperm.xlu1 %1517, %v822_v51  }
0x1053   :  { %v804_v52 = vpop.permute.xlu1 %803 }
0x1054   :  { %v806_v53 = vmul.f32 %v804_v52, %v784_v0  ;;  %v1082_v0 = vld [vmem:[#allocation4 + $0x6] sm:$0x3]  ;;  %v1080_v52 = vld [vmem:[#allocation4 + $0x2] sm:$0x3] }
0x1055   :  { %v1097_v45 = vmul.f32 %v1380_v22, %v1082_v0 }
0x1056   :  { %813 = vrot.lane.b32.xlu0 %v806_v53, %s1617_s2  ;;  %v1095_v53 = vmul.f32 %v1380_v22, %v1080_v52 }
0x1057   :  { %v1111_v47 = vsel %vm37_vm0, %v1097_v45, 0.0 }
0x105a   :  { %808 = vrot.lane.b32.xlu0 %v800_v48, %s1619_s9 }
0x1060   :  { %v825_v58 = vpop.permute.xlu1 %824 }
0x1061   :  { %vm826_vm5 = vcmp.eq.s32.totalorder %v825_v58, 1 }
0x1062   :  { %v827_v59 = vsel %vm826_vm5, %v1722_v12, %v1717_v11 }
0x10c8   :  { %v814_v54 = vpop.permute.xlu0 %813 }
0x10c9   :  { %816 = vst.msk [vmem:[#allocation2] sm:$0x3] %vm37_vm0, %v814_v54  ;;  %818 = vst.msk [vmem:[#allocation4 + $0xa] sm:$0x3] %vm37_vm0, %v814_v54  ;;  %v1081_v54 = vld [vmem:[#allocation4 + $0x4] sm:$0x3] }
0x10cc   :  { %v809_v55 = vpop.permute.xlu0 %808 }
0x10cd   :  { %811 = vst.msk [vmem:[#allocation3] sm:$0x3] %vm37_vm0, %v809_v55  ;;  %v1105_v55 = vsel %vm37_vm0, %v1095_v53, 0.0 }
0x10d0   :  { %v828_v56 = vld [vmem:[#allocation2] sm:$0x3]  ;;  %v1084_v46 = vld [vmem:[#allocation4 + $0xa] sm:$0x3] }
0x10d1   :  { %1497 = vmatmul.mubr.msk.f32.vlgmr.msra.gmra.mxu0 %vm53_vm3, %v828_v56  ;;  %v1099_v48 = vmul.f32 %v1380_v22, %v1084_v46  ;;  %v1096_v56 = vmul.f32 %v1380_v22, %v1081_v54 }
0x10d3   :  { %v1117_v49 = vsel %vm37_vm0, %v1099_v48, 0.0  ;;  %v1108_v58 = vsel %vm37_vm0, %v1096_v56, 0.0 }
0x10d4   :  { %v915_v57 = vld [vmem:[#allocation3] sm:$0x3] }
0x10d5   :  { %917 = vrot.lane.b32.xlu0 %v915_v57, %s1617_s2  ;;  %v1083_v57 = vld [vmem:[#allocation4 + $0x8] sm:$0x3] }
0x1147   :  { %v918_v15 = vpop.permute.xlu0 %917 }
0x1191   :  { %v902_v60 = vpop.f32.mrf.mxu0 }
0x1192   :  { %v906_v61 = vadd.f32 %v902_v60, %v827_v59  ;;  %v1098_v59 = vmul.f32 %v1380_v22, %v1083_v57 }
0x1193   :  { %v1498_v62 = vpop.f32.mrf.mxu0 }
0x1194   :  { %v1376_v63 = vmul.f32 -1.442695, %v906_v61 }
0x1196   :  { %1566 = vpow2.f32 %v1376_v63 }
0x1197   :  { %1568 = vtanh.f32 %v906_v61  ;;  %v1114_v61 = vsel %vm37_vm0, %v1098_v59, 0.0 }
0x11a3   :  { %v1567_v4 = vpop.eup %1566 }
0x11a4   :  { %v911_v6 = vadd.f32 1.0, %v1567_v4  ;;  %v1569_v8 = vpop.eup %1568  ;;  %v1927_v4 = vld [vmem:[#allocation5] ss:$0 sm:$0xff] }
0x11a6   :  { %1570 = vrcp.f32 %v911_v6 }
0x11b3   :  { %v1571_v9 = vpop.eup %1570 }
0x11b4   :  { %v914_v10 = vsel %vm1730_vm7, %v1569_v8, %v1571_v9 }
0x11b5   :  { %922 = vrot.lane.b32.xlu1 %v914_v10, %s1618_s1  ;;  %v920_v16 = vmul.f32 %v918_v15, %v914_v10 }
0x1227   :  { %v923_v13 = vpop.permute.xlu1 %922 }
0x1228   :  { %v925_v14 = vmul.f32 %v923_v13, %v914_v10 }
0x122a   :  { %927 = vrot.lane.b32.xlu1 %v925_v14, %s1617_s2 }
0x129c   :  { %v928_v17 = vpop.permute.xlu1 %927 }
0x129d   :  { %v930_v18 = vadd.f32 %v928_v17, %v920_v16 }
0x129f   :  { %1572 = vtanh.f32 %v930_v18 }
0x12ac   :  { %v1573_v20 = vpop.eup %1572 }
0x12ad   :  { %933 = vrot.lane.b32.xlu0 %v1573_v20, %s1618_s1 }
0x12b1   :  { %954 = vperm.xlu0 %1516, %v952_v23  }
0x131f   :  { %v934_v24 = vpop.permute.xlu0 %933 }
0x1320   :  { %v936_v25 = vmul.f32 %v934_v24, %v914_v10 }
0x1322   :  { %943 = vrot.lane.b32.xlu1 %v936_v25, %s1617_s2 }
0x1326   :  { %938 = vrot.lane.b32.xlu1 %v930_v18, %s1619_s9 }
0x132c   :  { %v955_v3 = vpop.permute.xlu0 %954 }
0x132d   :  { %vm956_vm8 = vcmp.eq.s32.totalorder %v955_v3, 1 }
0x132e   :  { %v957_v30 = vsel %vm956_vm8, %v1722_v12, %v1717_v11 }
0x1394   :  { %v944_v26 = vpop.permute.xlu1 %943 }
0x1395   :  { %946 = vst.msk [vmem:[#allocation2] sm:$0x3] %vm37_vm0, %v944_v26  ;;  %948 = vst.msk [vmem:[#allocation4 + $0xc] sm:$0x3] %vm37_vm0, %v944_v26 }
0x1398   :  { %v939_v27 = vpop.permute.xlu1 %938 }
0x1399   :  { %941 = vst.msk [vmem:[#allocation3] sm:$0x3] %vm37_vm0, %v939_v27 }
0x139c   :  { %v958_v28 = vld [vmem:[#allocation2] sm:$0x3]  ;;  %v1085_v60 = vld [vmem:[#allocation4 + $0xc] sm:$0x3] }
0x139d   :  { %1508 = vmatmul.mubr.msk.f32.vlgmr.msra.gmra.mxu1 %vm53_vm3, %v958_v28  ;;  %v1100_v62 = vmul.f32 %v1380_v22, %v1085_v60  ;;  %vm1342_vm3 = vcmask 9216  }
0x139f   :  { %v1120_v63 = vsel %vm37_vm0, %v1100_v62, 0.0 }
0x13a0   :  { %v1045_v29 = vld [vmem:[#allocation3] sm:$0x3] }
0x13a1   :  { %1047 = vrot.lane.b32.xlu1 %v1045_v29, %s1617_s2 }
0x1413   :  { %v1048_v11 = vpop.permute.xlu1 %1047 }
0x145d   :  { %v1032_v31 = vpop.f32.mrf.mxu1 }
0x145e   :  { %v1036_v32 = vadd.f32 %v1032_v31, %v957_v30 }
0x145f   :  { %v1509_v33 = vpop.f32.mrf.mxu1 }
0x1460   :  { %v1379_v34 = vmul.f32 -1.442695, %v1036_v32 }
0x1462   :  { %1574 = vpow2.f32 %v1379_v34 }
0x1463   :  { %1576 = vtanh.f32 %v1036_v32 }
0x146f   :  { %v1575_v35 = vpop.eup %1574 }
0x1470   :  { %v1041_v36 = vadd.f32 1.0, %v1575_v35  ;;  %v1577_v37 = vpop.eup %1576 }
0x1472   :  { %1578 = vrcp.f32 %v1041_v36 }
0x147f   :  { %v1579_v1 = vpop.eup %1578 }
0x1480   :  { %v1044_v38 = vsel %vm1730_vm7, %v1577_v37, %v1579_v1 }
0x1481   :  { %1052 = vrot.lane.b32.xlu0 %v1044_v38, %s1618_s1  ;;  %v1050_v12 = vmul.f32 %v1048_v11, %v1044_v38 }
0x14f3   :  { %v1053_v39 = vpop.permute.xlu0 %1052 }
0x14f4   :  { %v1055_v40 = vmul.f32 %v1053_v39, %v1044_v38 }
0x14f6   :  { %1057 = vrot.lane.b32.xlu0 %v1055_v40, %s1617_s2 }
0x1568   :  { %v1058_v41 = vpop.permute.xlu0 %1057 }
0x1569   :  { %v1060_v2 = vadd.f32 %v1058_v41, %v1050_v12 }
0x156b   :  { %1580 = vtanh.f32 %v1060_v2 }
0x1578   :  { %v1581_v42 = vpop.eup %1580 }
0x1579   :  { %1063 = vrot.lane.b32.xlu1 %v1581_v42, %s1618_s1 }
0x159d   :  { %1103 = vadd.xlane.f32.xlu1 %v1102_v44 }
0x15a1   :  { %1112 = vadd.xlane.f32.xlu1 %v1111_v47 }
0x15a5   :  { %1118 = vadd.xlane.f32.xlu1 %v1117_v49 }
0x15eb   :  { %v1064_v50 = vpop.permute.xlu1 %1063 }
0x15ec   :  { %v1066_v51 = vmul.f32 %v1064_v50, %v1044_v38 }
0x15ee   :  { %1073 = vrot.lane.b32.xlu0 %v1066_v51, %s1617_s2 }
0x160d   :  { %1106 = vadd.xlane.f32.xlu0 %v1105_v55 }
0x1611   :  { %1109 = vadd.xlane.f32.xlu0 %v1108_v58 }
0x1615   :  { %1115 = vadd.xlane.f32.xlu0 %v1114_v61 }
0x1619   :  { %1121 = vadd.xlane.f32.xlu0 %v1120_v63 }
0x1626   :  { %v1104_v6 = vpop.xlane.xlu1 %1103 }
0x1627   :  { %v1133_v8 = vadd.f32 %v1927_v4, %v1104_v6 }
0x1629   :  { %v1141_v9 = vand.u32 2147483647, %v1133_v8  ;;  %v1197_v16 = vsub.f32 0.0, %v1133_v8  ;;  %v1229_v27 = vmax.f32 %v1133_v8, 0.0 }
0x162a   :  { %v1113_v3 = vpop.xlane.xlu1 %1112 }
0x162b   :  { %v1149_v10 = vsub.f32 0.0, %v1141_v9  ;;  %v1205_v18 = vmax.f32 %v1197_v16, 0.0  ;;  %v1937_v30 = vadd.f32 %v1927_v4, %v1113_v3 }
0x162d   :  { %v1157_v13 = vmul.f32 1.442695, %v1149_v10  ;;  %v1144_v33 = vand.u32 2147483647, %v1937_v30 }
0x162e   :  { %v1119_v31 = vpop.xlane.xlu1 %1118 }
0x162f   :  { %1582 = vpow2.f32 %v1157_v13  ;;  %1068 = vrot.lane.b32.xlu0 %v1060_v2, %s1619_s9  ;;  %v1940_v32 = vadd.f32 %v1927_v4, %v1119_v31  ;;  %v1152_v35 = vsub.f32 0.0, %v1144_v33 }
0x1631   :  { %v1146_v34 = vand.u32 2147483647, %v1940_v32  ;;  %v1163_v37 = vmul.f32 1.442695, %v1152_v35 }
0x1633   :  { %v1154_v36 = vsub.f32 0.0, %v1146_v34 }
0x1635   :  { %v1167_v39 = vmul.f32 1.442695, %v1154_v36  ;;  %v1200_v36 = vsub.f32 0.0, %v1937_v30 }
0x163c   :  { %v1583_v14 = vpop.eup %1582 }
0x163d   :  { %v1173_v15 = vadd.f32 1.0, %v1583_v14 }
0x163f   :  { %1584 = vlog2.f32 %v1173_v15  ;;  %v1232_v15 = vmax.f32 %v1937_v30, 0.0 }
0x1640   :  { %1586 = vpow2.f32 %v1163_v37 }
0x1641   :  { %1588 = vpow2.f32 %v1167_v39 }
0x164c   :  { %v1585_v17 = vpop.eup %1584 }
0x164d   :  { %v1182_v19 = vmul.f32 0.6931472, %v1585_v17  ;;  %v1587_v49 = vpop.eup %1586 }
0x164e   :  { %v1589_v52 = vpop.eup %1588  ;;  %v1176_v53 = vadd.f32 1.0, %v1587_v49 }
0x164f   :  { %v1931_v20 = vadd.f32 %v1205_v18, %v1182_v19  ;;  %v1237_v28 = vadd.f32 %v1229_v27, %v1182_v19  ;;  %v1178_v56 = vadd.f32 1.0, %v1589_v52 }
0x1651   :  { %v1245_v29 = vsub.f32 0.0, %v1237_v28  ;;  %v1221_v49 = vsub.f32 0.0, %v1931_v20 }
0x1660   :  { %v1074_v23 = vpop.permute.xlu0 %1073 }
0x1661   :  { %1076 = vst.msk [vmem:[#allocation2] sm:$0x3] %vm37_vm0, %v1074_v23  ;;  %1078 = vst.msk [vmem:[#allocation4 + $0xe] sm:$0x3] %vm37_vm0, %v1074_v23 }
0x1668   :  { %v1086_v24 = vld [vmem:[#allocation4 + $0xe] sm:$0x3] }
0x1669   :  { %v1101_v25 = vmul.f32 %v1380_v22, %v1086_v24 }
0x166b   :  { %v1123_v26 = vsel %vm37_vm0, %v1101_v25, 0.0 }
0x166c   :  { %1124 = vadd.xlane.f32.xlu1 %v1123_v26  ;;  %v1234_v26 = vmax.f32 %v1940_v32, 0.0 }
0x167d   :  { %1256 = vperm.xlu1 %1517, %v1245_v29  }
0x1696   :  { %v1107_v1 = vpop.xlane.xlu0 %1106 }
0x1697   :  { %v1945_v38 = vadd.f32 %v1927_v4, %v1107_v1 }
0x1699   :  { %v1142_v40 = vand.u32 2147483647, %v1945_v38  ;;  %v1230_v10 = vmax.f32 %v1945_v38, 0.0  ;;  %v1198_v27 = vsub.f32 0.0, %v1945_v38 }
0x169a   :  { %v1110_v11 = vpop.xlane.xlu0 %1109 }
0x169b   :  { %v1150_v12 = vsub.f32 0.0, %v1142_v40  ;;  %v1949_v41 = vadd.f32 %v1927_v4, %v1110_v11  ;;  %v1206_v37 = vmax.f32 %v1198_v27, 0.0 }
0x169d   :  { %v1159_v2 = vmul.f32 1.442695, %v1150_v12  ;;  %v1143_v42 = vand.u32 2147483647, %v1949_v41  ;;  %v1231_v19 = vmax.f32 %v1949_v41, 0.0 }
0x169e   :  { %v1116_v43 = vpop.xlane.xlu0 %1115 }
0x169f   :  { %1590 = vpow2.f32 %v1159_v2  ;;  %v1151_v22 = vsub.f32 0.0, %v1143_v42  ;;  %v1953_v5 = vadd.f32 %v1927_v4, %v1116_v43  ;;  %v1208_v42 = vmax.f32 %v1200_v36, 0.0 }
0x16a0   :  { %v1202_v43 = vsub.f32 0.0, %v1940_v32 }
0x16a1   :  { %v1161_v0 = vmul.f32 1.442695, %v1151_v22  ;;  %v1145_v7 = vand.u32 2147483647, %v1953_v5  ;;  %v1233_v31 = vmax.f32 %v1953_v5, 0.0  ;;  %v1199_v22 = vsub.f32 0.0, %v1949_v41 }
0x16a2   :  { %v1122_v44 = vpop.xlane.xlu0 %1121 }
0x16a3   :  { %1592 = vpow2.f32 %v1161_v0  ;;  %v1153_v45 = vsub.f32 0.0, %v1145_v7  ;;  %v1957_v46 = vadd.f32 %v1927_v4, %v1122_v44 }
0x16a5   :  { %v1165_v47 = vmul.f32 1.442695, %v1153_v45  ;;  %v1147_v48 = vand.u32 2147483647, %v1957_v46  ;;  %v1235_v11 = vmax.f32 %v1957_v46, 0.0  ;;  %v1210_v45 = vmax.f32 %v1202_v43, 0.0 }
0x16a6   :  { %v1069_v50 = vpop.permute.xlu0 %1068  ;;  %v1203_v41 = vsub.f32 0.0, %v1957_v46 }
0x16a7   :  { %1594 = vpow2.f32 %v1165_v47  ;;  %v1155_v51 = vsub.f32 0.0, %v1147_v48  ;;  %1071 = vst.msk [vmem:[#allocation3] sm:$0x3] %vm37_vm0, %v1069_v50  ;;  %v1207_v47 = vmax.f32 %v1199_v22, 0.0  ;;  %v1201_v48 = vsub.f32 0.0, %v1953_v5 }
0x16a8   :  { %vm1253_vm0 = vcmp.eq.s32.totalorder %v1726_v21, 0 }
0x16a9   :  { %v1169_v54 = vmul.f32 1.442695, %v1155_v51  ;;  %v1209_v32 = vmax.f32 %v1201_v48, 0.0 }
0x16ab   :  { %1596 = vpow2.f32 %v1169_v54 }
0x16ac   :  { %v1591_v55 = vpop.eup %1590  ;;  %1598 = vlog2.f32 %v1176_v53 }
0x16ad   :  { %v1174_v57 = vadd.f32 1.0, %v1591_v55 }
0x16af   :  { %1600 = vlog2.f32 %v1174_v57 }
0x16b0   :  { %v1593_v58 = vpop.eup %1592  ;;  %1602 = vlog2.f32 %v1178_v56  ;;  %v1211_v56 = vmax.f32 %v1203_v41, 0.0 }
0x16b1   :  { %v1175_v59 = vadd.f32 1.0, %v1593_v58 }
0x16b3   :  { %1604 = vlog2.f32 %v1175_v59 }
0x16b4   :  { %v1595_v60 = vpop.eup %1594 }
0x16b5   :  { %v1177_v61 = vadd.f32 1.0, %v1595_v60 }
0x16b7   :  { %1606 = vlog2.f32 %v1177_v61 }
0x16b8   :  { %v1597_v62 = vpop.eup %1596 }
0x16b9   :  { %v1179_v63 = vadd.f32 1.0, %v1597_v62  ;;  %v1599_v6 = vpop.eup %1598 }
0x16ba   :  { %v1188_v14 = vmul.f32 0.6931472, %v1599_v6 }
0x16bb   :  { %1608 = vlog2.f32 %v1179_v63 }
0x16bc   :  { %v1601_v8 = vpop.eup %1600  ;;  %v1240_v25 = vadd.f32 %v1232_v15, %v1188_v14  ;;  %v1216_v44 = vadd.f32 %v1208_v42, %v1188_v14 }
0x16bd   :  { %v1603_v9 = vpop.eup %1602  ;;  %v1184_v13 = vmul.f32 0.6931472, %v1601_v8 }
0x16be   :  { %v1192_v18 = vmul.f32 0.6931472, %v1603_v9  ;;  %v1248_v34 = vsub.f32 0.0, %v1240_v25  ;;  %v1224_v50 = vsub.f32 0.0, %v1216_v44 }
0x16bf   :  { %v1238_v16 = vadd.f32 %v1230_v10, %v1184_v13  ;;  %v1214_v2 = vadd.f32 %v1206_v37, %v1184_v13 }
0x16c0   :  { %v1605_v17 = vpop.eup %1604  ;;  %v1242_v3 = vadd.f32 %v1234_v26, %v1192_v18  ;;  %v1218_v52 = vadd.f32 %v1210_v45, %v1192_v18 }
0x16c1   :  { %v1246_v23 = vsub.f32 0.0, %v1238_v16  ;;  %v1186_v24 = vmul.f32 0.6931472, %v1605_v17  ;;  %v1222_v7 = vsub.f32 0.0, %v1214_v2 }
0x16c2   :  { %v1250_v40 = vsub.f32 0.0, %v1242_v3  ;;  %v1226_v54 = vsub.f32 0.0, %v1218_v52 }
0x16c3   :  { %1261 = vperm.xlu1 %1517, %v1246_v23   ;;  %v1239_v28 = vadd.f32 %v1231_v19, %v1186_v24  ;;  %v1215_v51 = vadd.f32 %v1207_v47, %v1186_v24 }
0x16c4   :  { %v1607_v29 = vpop.eup %1606 }
0x16c5   :  { %v1247_v33 = vsub.f32 0.0, %v1239_v28  ;;  %v1190_v35 = vmul.f32 0.6931472, %v1607_v29  ;;  %v1223_v53 = vsub.f32 0.0, %v1215_v51 }
0x16c7   :  { %1266 = vperm.xlu0 %1516, %v1247_v33   ;;  %1271 = vperm.xlu1 %1517, %v1248_v34   ;;  %v1241_v1 = vadd.f32 %v1233_v31, %v1190_v35  ;;  %v1217_v55 = vadd.f32 %v1209_v32, %v1190_v35 }
0x16c8   :  { %v1609_v39 = vpop.eup %1608 }
0x16c9   :  { %v1249_v38 = vsub.f32 0.0, %v1241_v1  ;;  %v1194_v12 = vmul.f32 0.6931472, %v1609_v39  ;;  %v1225_v57 = vsub.f32 0.0, %v1217_v55 }
0x16cb   :  { %1276 = vperm.xlu0 %1516, %v1249_v38   ;;  %1281 = vperm.xlu1 %1517, %v1250_v40   ;;  %v1243_v0 = vadd.f32 %v1235_v11, %v1194_v12  ;;  %v1219_v5 = vadd.f32 %v1211_v56, %v1194_v12 }
0x16cd   :  { %v1251_v30 = vsub.f32 0.0, %v1243_v0  ;;  %v1227_v58 = vsub.f32 0.0, %v1219_v5 }
0x16cf   :  { %1286 = vperm.xlu0 %1516, %v1251_v30   ;;  %1301 = vperm.xlu1 %1517, %v1222_v7  }
0x16d3   :  { %1296 = vperm.xlu0 %1516, %v1221_v49   ;;  %1311 = vperm.xlu1 %1517, %v1224_v50  }
0x16d7   :  { %1306 = vperm.xlu0 %1516, %v1223_v53   ;;  %1321 = vperm.xlu1 %1517, %v1226_v54  }
0x16db   :  { %1316 = vperm.xlu0 %1516, %v1225_v57  }
0x16df   :  { %1326 = vperm.xlu0 %1516, %v1227_v58  }
0x16f5   :  { %v1125_v20 = vpop.xlane.xlu1 %1124 }
0x16f6   :  { %v1140_v59 = vadd.f32 %v1927_v4, %v1125_v20 }
0x16f8   :  { %v1148_v60 = vand.u32 2147483647, %v1140_v59  ;;  %v1204_v6 = vsub.f32 0.0, %v1140_v59  ;;  %v1236_v9 = vmax.f32 %v1140_v59, 0.0 }
0x16f9   :  { %v1257_v18 = vpop.permute.xlu1 %1256 }
0x16fa   :  { %v1156_v61 = vsub.f32 0.0, %v1148_v60  ;;  %v1212_v13 = vmax.f32 %v1204_v6, 0.0 }
0x16fc   :  { %v1171_v62 = vmul.f32 1.442695, %v1156_v61 }
0x16fe   :  { %1610 = vpow2.f32 %v1171_v62 }
0x170b   :  { %v1611_v46 = vpop.eup %1610 }
0x170c   :  { %v1180_v63 = vadd.f32 1.0, %v1611_v46 }
0x170e   :  { %1612 = vlog2.f32 %v1180_v63 }
0x171b   :  { %v1613_v8 = vpop.eup %1612 }
0x171c   :  { %v1196_v10 = vmul.f32 0.6931472, %v1613_v8 }
0x171e   :  { %v1244_v14 = vadd.f32 %v1236_v9, %v1196_v10  ;;  %v1220_v16 = vadd.f32 %v1212_v13, %v1196_v10 }
0x1720   :  { %v1252_v15 = vsub.f32 0.0, %v1244_v14  ;;  %v1228_v17 = vsub.f32 0.0, %v1220_v16 }
0x1722   :  { %1291 = vperm.xlu1 %1517, %v1252_v15  }
0x1726   :  { %1331 = vperm.xlu1 %1517, %v1228_v17  }
0x173e   :  { %v1262_v4 = vpop.permute.xlu1 %1261 }
0x1742   :  { %v1267_v19 = vpop.permute.xlu0 %1266  ;;  %v1272_v23 = vpop.permute.xlu1 %1271 }
0x1746   :  { %v1277_v24 = vpop.permute.xlu0 %1276  ;;  %v1282_v25 = vpop.permute.xlu1 %1281 }
0x174a   :  { %v1287_v26 = vpop.permute.xlu0 %1286  ;;  %v1302_v27 = vpop.permute.xlu1 %1301 }
0x174b   :  { %v1335_v28 = vsel %vm1253_vm0, %v1262_v4, %v1302_v27 }
0x174c   :  { %1344 = vst.msk [vmem:[%s2029_s5 + $0x2] sm:$0x3] %vm1342_vm3, %v1335_v28 }
0x174e   :  { %v1297_v29 = vpop.permute.xlu0 %1296  ;;  %v1312_v3 = vpop.permute.xlu1 %1311 }
0x174f   :  { %v1334_v31 = vsel %vm1253_vm0, %v1257_v18, %v1297_v29  ;;  %v1337_v33 = vsel %vm1253_vm0, %v1272_v23, %v1312_v3 }
0x1750   :  { %1343 = vst.msk [vmem:[%s2029_s5] sm:$0x3] %vm1342_vm3, %v1334_v31  ;;  %1346 = vst.msk [vmem:[%s2029_s5 + $0x6] sm:$0x3] %vm1342_vm3, %v1337_v33 }
0x1752   :  { %v1307_v34 = vpop.permute.xlu0 %1306  ;;  %v1322_v35 = vpop.permute.xlu1 %1321 }
0x1753   :  { %v1336_v36 = vsel %vm1253_vm0, %v1267_v19, %v1307_v34  ;;  %v1339_v37 = vsel %vm1253_vm0, %v1282_v25, %v1322_v35 }
0x1754   :  { %1345 = vst.msk [vmem:[%s2029_s5 + $0x4] sm:$0x3] %vm1342_vm3, %v1336_v36  ;;  %1348 = vst.msk [vmem:[%s2029_s5 + $0xa] sm:$0x3] %vm1342_vm3, %v1339_v37 }
0x1756   :  { %v1317_v1 = vpop.permute.xlu0 %1316 }
0x1757   :  { %v1338_v39 = vsel %vm1253_vm0, %v1277_v24, %v1317_v1 }
0x1758   :  { %1347 = vst.msk [vmem:[%s2029_s5 + $0x8] sm:$0x3] %vm1342_vm3, %v1338_v39 }
0x175a   :  { %v1327_v40 = vpop.permute.xlu0 %1326 }
0x175b   :  { %v1340_v11 = vsel %vm1253_vm0, %v1287_v26, %v1327_v40 }
0x175c   :  { %1349 = vst.msk [vmem:[%s2029_s5 + $0xc] sm:$0x3] %vm1342_vm3, %v1340_v11 }
0x179d   :  { %v1292_v38 = vpop.permute.xlu1 %1291 }
0x17a1   :  { %v1332_v12 = vpop.permute.xlu1 %1331 }
0x17a2   :  { %v1341_v2 = vsel %vm1253_vm0, %v1292_v38, %v1332_v12 }
0x17a3   :  { %1350 = vst.msk [vmem:[%s2029_s5 + $0xe] sm:$0x3] %vm1342_vm3, %v1341_v2 }

</bundles_post_ra>
